<compile_context>
chip_gen: v7x
topology: tpu7x:2x2x1
jax: 0.10.0
libtpu: 0.0.40
codegen_flags: <defaults>
</compile_context>

<pallas_src>
import functools

import jax
import jax.numpy as jnp
from jax.experimental import pallas as pl
from jax.experimental.pallas import tpu as pltpu


def _spatial_attention_kernel(w_ref, x_ref, o_ref, sum_ref, max_ref, *,
                              n_channels, channel_tile, out_h, out_w, ksize,
                              mask_tail):
    c_blk = pl.program_id(1)
    last_blk = pl.num_programs(1) - 1

    @pl.when(c_blk == 0)
    def _init():
        sum_ref[...] = jnp.zeros_like(sum_ref)
        max_ref[...] = jnp.full_like(max_ref, -jnp.inf)

    xb = x_ref[0]  # (channel_tile, H+2p, W+2p), native dtype

    if mask_tail:
        ch = c_blk * channel_tile + jax.lax.broadcasted_iota(jnp.int32, xb.shape, 0)
        valid = ch < n_channels
        x_sum = jnp.where(valid, xb, jnp.zeros((), dtype=xb.dtype))
        x_max = jnp.where(valid, xb, jnp.array(-jnp.inf, dtype=xb.dtype))
    else:
        x_sum = xb
        x_max = xb

    # Reduce in native dtype with an f32 accumulator in VMEM scratch.
    sum_ref[...] += jnp.sum(x_sum, axis=0, dtype=jnp.float32)
    max_ref[...] = jnp.maximum(max_ref[...],
                               jnp.max(x_max, axis=0).astype(jnp.float32))

    @pl.when(c_blk == last_blk)
    def _finalize():
        avg_pad = sum_ref[...] * (1.0 / n_channels)   # (H+2p, W+2p) f32
        max_pad = max_ref[...]                        # (H+2p, W+2p) f32
        kk = ksize * ksize
        acc = jnp.zeros((out_h, out_w), jnp.float32)
        for t in range(kk):                           # unrolled KxK taps
            di, dj = divmod(t, ksize)
            acc = acc + (w_ref[t] * avg_pad[di:di + out_h, dj:dj + out_w]
                         + w_ref[kk + t] * max_pad[di:di + out_h, dj:dj + out_w])
        o_ref[0, 0] = jax.nn.sigmoid(acc).astype(o_ref.dtype)


def _pick_channel_tile(n_channels, hp, wp, itemsize, budget_bytes=8 * 1024 * 1024):
    # Target a few MiB per (double-buffered) input tile so it fits v7x's 64 MiB
    # VMEM / v5e's smaller scoped default comfortably.
    per_channel = hp * wp * itemsize
    tile = max(1, min(n_channels, budget_bytes // max(per_channel, 1)))
    if tile >= 8:
        tile = (tile // 8) * 8
    return int(tile)


def spatial_attention(x, conv_w, kernel_size=7, channel_tile=None):
    """x: (N, C, H, W) NCHW. conv_w: (1, 2, K, K) Conv2d weight (no bias).
    Returns sigmoid(conv([mean_c(x), max_c(x)])) with shape (N, 1, H, W)."""
    assert kernel_size in (3, 7), "kernel size must be 3 or 7"
    pad = 3 if kernel_size == 7 else 1
    N, C, H, W = x.shape
    K = kernel_size
    assert conv_w.shape == (1, 2, K, K)
    Hp, Wp = H + 2 * pad, W + 2 * pad

    # Zero-pad spatially once; pooling zeros over channels == conv zero padding.
    x_pad = jnp.pad(x, ((0, 0), (0, 0), (pad, pad), (pad, pad)))
    # Flat tap table: first K*K taps act on the avg map, next K*K on the max map.
    w_flat = conv_w.astype(jnp.float32).reshape(2 * K * K)

    itemsize = jnp.dtype(x.dtype).itemsize
    if channel_tile is None:
        channel_tile = _pick_channel_tile(C, Hp, Wp, itemsize)
    channel_tile = int(min(channel_tile, C))
    num_c_blocks = pl.cdiv(C, channel_tile)

    kernel = functools.partial(
        _spatial_attention_kernel,
        n_channels=C, channel_tile=channel_tile, out_h=H, out_w=W, ksize=K,
        mask_tail=(C % channel_tile) != 0)

    # Explicit VMEM budget: 2x (double-buffered) input tile + output + scratch.
    x_tile_bytes = channel_tile * Hp * Wp * itemsize
    vmem_est = 2 * x_tile_bytes + 2 * H * W * itemsize + 2 * Hp * Wp * 4 + (1 << 20)
    vmem_limit = int(min(max(2 * vmem_est, 32 * 1024 * 1024), 64 * 1024 * 1024))

    # TODO(synk): for very large H*W, additionally tile the spatial axes with a
    # `pad`-wide halo so the per-step block stays within a few MiB on v7x.
    out = pl.pallas_call(
        kernel,
        out_shape=jax.ShapeDtypeStruct((N, 1, H, W), x.dtype),
        grid=(N, num_c_blocks),
        in_specs=[
            pl.BlockSpec(memory_space=pltpu.MemorySpace.SMEM),              # conv taps
            pl.BlockSpec((1, channel_tile, Hp, Wp), lambda n, c: (n, c, 0, 0)),
        ],
        out_specs=pl.BlockSpec((1, 1, H, W), lambda n, c: (n, 0, 0, 0)),
        scratch_shapes=[
            pltpu.VMEM((Hp, Wp), jnp.float32),   # running channel sum (f32)
            pltpu.VMEM((Hp, Wp), jnp.float32),   # running channel max (f32)
        ],
        compiler_params=pltpu.CompilerParams(
            dimension_semantics=("parallel", "arbitrary"),
            vmem_limit_bytes=vmem_limit,
        ),
    )(w_flat, x_pad)
    return out


def reference(x, conv_w, kernel_size=7):
    # Pure-JAX reference matching the PyTorch forward.
    pad = 3 if kernel_size == 7 else 1
    avg = jnp.mean(x, axis=1, keepdims=True)
    mx = jnp.max(x, axis=1, keepdims=True)
    s = jnp.concatenate([avg, mx], axis=1)                     # (N, 2, H, W)
    out = jax.lax.conv_general_dilated(
        s, conv_w, window_strides=(1, 1), padding=[(pad, pad), (pad, pad)],
        dimension_numbers=("NCHW", "OIHW", "NCHW"),
        precision=jax.lax.Precision.HIGHEST)
    return jax.nn.sigmoid(out)                                 # (N, 1, H, W)


if __name__ == "__main__":
    key = jax.random.PRNGKey(0)
    k1, k2, k3, k4 = jax.random.split(key, 4)

    # Case 1: f32, 7x7 conv, channel reduction pipelined over 2 grid steps.
    N, C, H, W = 2, 16, 16, 16
    x = jax.random.normal(k1, (N, C, H, W), dtype=jnp.float32)
    w7 = jax.random.normal(k2, (1, 2, 7, 7), dtype=jnp.float32) * 0.1
    out = jax.block_until_ready(
        spatial_attention(x, w7, kernel_size=7, channel_tile=8))
    ref = reference(x, w7, kernel_size=7)
    assert out.shape == (N, 1, H, W)
    assert jnp.allclose(out, ref, atol=2e-5, rtol=2e-5)

    # Case 2: bf16 input, 3x3 conv, C not a multiple of the channel tile (tail mask).
    N2, C2, H2, W2 = 1, 12, 20, 24
    x2 = jax.random.normal(k3, (N2, C2, H2, W2), dtype=jnp.float32).astype(jnp.bfloat16)
    w3 = jax.random.normal(k4, (1, 2, 3, 3), dtype=jnp.float32) * 0.1
    out2 = jax.block_until_ready(
        spatial_attention(x2, w3, kernel_size=3, channel_tile=8))
    ref2 = reference(x2.astype(jnp.float32), w3, kernel_size=3)
    assert out2.shape == (N2, 1, H2, W2)
    assert jnp.allclose(out2.astype(jnp.float32), ref2, atol=2e-2, rtol=2e-2)

    print("KERNEL_OK")
</pallas_src>

<mosaic_0001>
module attributes {stable_mosaic.version = 11 : i64} {
  func.func @_spatial_attention_kernel(%arg0: i32, %arg1: i32, %arg2: memref<98xf32, #tpu.memory_space<smem>>, %arg3: memref<1x8x22x22xf32, #tpu.memory_space<vmem>>, %arg4: memref<1x1x16x16xf32, #tpu.memory_space<vmem>>, %arg5: memref<22x22xf32, #tpu.memory_space<vmem>>, %arg6: memref<22x22xf32, #tpu.memory_space<vmem>>) attributes {dimension_semantics = [#tpu.dimension_semantics<parallel>, #tpu.dimension_semantics<arbitrary>], iteration_bounds = array<i64: 2, 2>, scalar_prefetch = 0 : i64, scratch_operands = 2 : i64, tpu.core_type = #tpu.core_type<tc>, window_params = [{transform_indices = @transform_0, window_bounds = array<i64: 98>}, {transform_indices = @transform_1, window_bounds = array<i64: 1, 8, 22, 22>}, {transform_indices = @transform_2, window_bounds = array<i64: 1, 1, 16, 16>}]} {
    %c0_i32 = arith.constant 0 : i32
    %0 = arith.cmpi eq, %arg1, %c0_i32 : i32
    %1 = arith.extui %0 : i1 to i32
    %c0_i32_0 = arith.constant 0 : i32
    %2 = arith.cmpi ne, %1, %c0_i32_0 : i32
    scf.if %2 {
      %cst_14 = arith.constant 0.000000e+00 : f32
      %16 = vector.broadcast %cst_14 : f32 to vector<22x22xf32>
      %c0_15 = arith.constant 0 : index
      %c0_16 = arith.constant 0 : index
      %17 = vector.load %arg5[%c0_15, %c0_16] : memref<22x22xf32, #tpu.memory_space<vmem>>, vector<22x22xf32>
      tpu.vector_store %arg5[%c0_15, %c0_16], %16 {strides = array<i32>} : memref<22x22xf32, #tpu.memory_space<vmem>>, vector<22x22xf32>,
      %cst_17 = arith.constant 0xFF800000 : f32
      %18 = vector.broadcast %cst_17 : f32 to vector<22x22xf32>
      %c0_18 = arith.constant 0 : index
      %c0_19 = arith.constant 0 : index
      %19 = vector.load %arg6[%c0_18, %c0_19] : memref<22x22xf32, #tpu.memory_space<vmem>>, vector<22x22xf32>
      tpu.vector_store %arg6[%c0_18, %c0_19], %18 {strides = array<i32>} : memref<22x22xf32, #tpu.memory_space<vmem>>, vector<22x22xf32>,
    } else {
    }
    %c0 = arith.constant 0 : index
    %c0_1 = arith.constant 0 : index
    %c0_2 = arith.constant 0 : index
    %c0_3 = arith.constant 0 : index
    %3 = vector.load %arg3[%c0, %c0_1, %c0_2, %c0_3] : memref<1x8x22x22xf32, #tpu.memory_space<vmem>>, vector<1x8x22x22xf32>
    %4 = vector.shape_cast %3 : vector<1x8x22x22xf32> to vector<8x22x22xf32>
    %c0_4 = arith.constant 0 : index
    %c0_5 = arith.constant 0 : index
    %5 = vector.load %arg5[%c0_4, %c0_5] : memref<22x22xf32, #tpu.memory_space<vmem>>, vector<22x22xf32>
    %cst = arith.constant dense<0.000000e+00> : vector<22x22xf32>
    %6 = vector.multi_reduction <add>, %4, %cst [0] : vector<8x22x22xf32> to vector<22x22xf32>
    %7 = arith.addf %5, %6 : vector<22x22xf32>
    %c0_6 = arith.constant 0 : index
    %c0_7 = arith.constant 0 : index
    %8 = vector.load %arg5[%c0_6, %c0_7] : memref<22x22xf32, #tpu.memory_space<vmem>>, vector<22x22xf32>
    tpu.vector_store %arg5[%c0_6, %c0_7], %7 {strides = array<i32>} : memref<22x22xf32, #tpu.memory_space<vmem>>, vector<22x22xf32>,
    %c0_8 = arith.constant 0 : index
    %c0_9 = arith.constant 0 : index
    %9 = vector.load %arg6[%c0_8, %c0_9] : memref<22x22xf32, #tpu.memory_space<vmem>>, vector<22x22xf32>
    %cst_10 = arith.constant dense<0xFF800000> : vector<22x22xf32>
    %10 = vector.multi_reduction <maximumf>, %4, %cst_10 [0] : vector<8x22x22xf32> to vector<22x22xf32>
    %11 = arith.maximumf %9, %10 : vector<22x22xf32>
    %c0_11 = arith.constant 0 : index
    %c0_12 = arith.constant 0 : index
    %12 = vector.load %arg6[%c0_11, %c0_12] : memref<22x22xf32, #tpu.memory_space<vmem>>, vector<22x22xf32>
    tpu.vector_store %arg6[%c0_11, %c0_12], %11 {strides = array<i32>} : memref<22x22xf32, #tpu.memory_space<vmem>>, vector<22x22xf32>,
    %c1_i32 = arith.constant 1 : i32
    %13 = arith.cmpi eq, %arg1, %c1_i32 : i32
    %14 = arith.extui %13 : i1 to i32
    %c0_i32_13 = arith.constant 0 : i32
    %15 = arith.cmpi ne, %14, %c0_i32_13 : i32
    scf.if %15 {
      %c0_14 = arith.constant 0 : index
      %c0_15 = arith.constant 0 : index
      %16 = vector.load %arg5[%c0_14, %c0_15] : memref<22x22xf32, #tpu.memory_space<vmem>>, vector<22x22xf32>
      %cst_16 = arith.constant 6.250000e-02 : f32
      %17 = vector.broadcast %cst_16 : f32 to vector<22x22xf32>
      %18 = arith.mulf %16, %17 : vector<22x22xf32>
      %c0_17 = arith.constant 0 : index
      %c0_18 = arith.constant 0 : index
      %19 = vector.load %arg6[%c0_17, %c0_18] : memref<22x22xf32, #tpu.memory_space<vmem>>, vector<22x22xf32>
      %cst_19 = arith.constant 0.000000e+00 : f32
      %20 = vector.broadcast %cst_19 : f32 to vector<16x16xf32>
      %c0_20 = arith.constant 0 : index
      %21 = memref.load %arg2[%c0_20] : memref<98xf32, #tpu.memory_space<smem>>
      %22 = vector.extract_strided_slice %18 {offsets = [0, 0], sizes = [16, 16], strides = [1, 1]} : vector<22x22xf32> to vector<16x16xf32>
      %23 = vector.broadcast %21 : f32 to vector<16x16xf32>
      %24 = arith.mulf %23, %22 : vector<16x16xf32>
      %c49 = arith.constant 49 : index
      %25 = memref.load %arg2[%c49] : memref<98xf32, #tpu.memory_space<smem>>
      %26 = vector.extract_strided_slice %19 {offsets = [0, 0], sizes = [16, 16], strides = [1, 1]} : vector<22x22xf32> to vector<16x16xf32>
      %27 = vector.broadcast %25 : f32 to vector<16x16xf32>
      %28 = arith.mulf %27, %26 : vector<16x16xf32>
      %29 = arith.addf %24, %28 : vector<16x16xf32>
      %30 = arith.addf %20, %29 : vector<16x16xf32>
      %c1 = arith.constant 1 : index
      %31 = memref.load %arg2[%c1] : memref<98xf32, #tpu.memory_space<smem>>
      %32 = vector.extract_strided_slice %18 {offsets = [0, 1], sizes = [16, 16], strides = [1, 1]} : vector<22x22xf32> to vector<16x16xf32>
      %33 = vector.broadcast %31 : f32 to vector<16x16xf32>
      %34 = arith.mulf %33, %32 : vector<16x16xf32>
      %c50 = arith.constant 50 : index
      %35 = memref.load %arg2[%c50] : memref<98xf32, #tpu.memory_space<smem>>
      %36 = vector.extract_strided_slice %19 {offsets = [0, 1], sizes = [16, 16], strides = [1, 1]} : vector<22x22xf32> to vector<16x16xf32>
      %37 = vector.broadcast %35 : f32 to vector<16x16xf32>
      %38 = arith.mulf %37, %36 : vector<16x16xf32>
      %39 = arith.addf %34, %38 : vector<16x16xf32>
      %40 = arith.addf %30, %39 : vector<16x16xf32>
      %c2 = arith.constant 2 : index
      %41 = memref.load %arg2[%c2] : memref<98xf32, #tpu.memory_space<smem>>
      %42 = vector.extract_strided_slice %18 {offsets = [0, 2], sizes = [16, 16], strides = [1, 1]} : vector<22x22xf32> to vector<16x16xf32>
      %43 = vector.broadcast %41 : f32 to vector<16x16xf32>
      %44 = arith.mulf %43, %42 : vector<16x16xf32>
      %c51 = arith.constant 51 : index
      %45 = memref.load %arg2[%c51] : memref<98xf32, #tpu.memory_space<smem>>
      %46 = vector.extract_strided_slice %19 {offsets = [0, 2], sizes = [16, 16], strides = [1, 1]} : vector<22x22xf32> to vector<16x16xf32>
      %47 = vector.broadcast %45 : f32 to vector<16x16xf32>
      %48 = arith.mulf %47, %46 : vector<16x16xf32>
      %49 = arith.addf %44, %48 : vector<16x16xf32>
      %50 = arith.addf %40, %49 : vector<16x16xf32>
      %c3 = arith.constant 3 : index
      %51 = memref.load %arg2[%c3] : memref<98xf32, #tpu.memory_space<smem>>
      %52 = vector.extract_strided_slice %18 {offsets = [0, 3], sizes = [16, 16], strides = [1, 1]} : vector<22x22xf32> to vector<16x16xf32>
      %53 = vector.broadcast %51 : f32 to vector<16x16xf32>
      %54 = arith.mulf %53, %52 : vector<16x16xf32>
      %c52 = arith.constant 52 : index
      %55 = memref.load %arg2[%c52] : memref<98xf32, #tpu.memory_space<smem>>
      %56 = vector.extract_strided_slice %19 {offsets = [0, 3], sizes = [16, 16], strides = [1, 1]} : vector<22x22xf32> to vector<16x16xf32>
      %57 = vector.broadcast %55 : f32 to vector<16x16xf32>
      %58 = arith.mulf %57, %56 : vector<16x16xf32>
      %59 = arith.addf %54, %58 : vector<16x16xf32>
      %60 = arith.addf %50, %59 : vector<16x16xf32>
      %c4 = arith.constant 4 : index
      %61 = memref.load %arg2[%c4] : memref<98xf32, #tpu.memory_space<smem>>
      %62 = vector.extract_strided_slice %18 {offsets = [0, 4], sizes = [16, 16], strides = [1, 1]} : vector<22x22xf32> to vector<16x16xf32>
      %63 = vector.broadcast %61 : f32 to vector<16x16xf32>
      %64 = arith.mulf %63, %62 : vector<16x16xf32>
      %c53 = arith.constant 53 : index
      %65 = memref.load %arg2[%c53] : memref<98xf32, #tpu.memory_space<smem>>
      %66 = vector.extract_strided_slice %19 {offsets = [0, 4], sizes = [16, 16], strides = [1, 1]} : vector<22x22xf32> to vector<16x16xf32>
      %67 = vector.broadcast %65 : f32 to vector<16x16xf32>
      %68 = arith.mulf %67, %66 : vector<16x16xf32>
      %69 = arith.addf %64, %68 : vector<16x16xf32>
      %70 = arith.addf %60, %69 : vector<16x16xf32>
      %c5 = arith.constant 5 : index
      %71 = memref.load %arg2[%c5] : memref<98xf32, #tpu.memory_space<smem>>
      %72 = vector.extract_strided_slice %18 {offsets = [0, 5], sizes = [16, 16], strides = [1, 1]} : vector<22x22xf32> to vector<16x16xf32>
      %73 = vector.broadcast %71 : f32 to vector<16x16xf32>
      %74 = arith.mulf %73, %72 : vector<16x16xf32>
      %c54 = arith.constant 54 : index
      %75 = memref.load %arg2[%c54] : memref<98xf32, #tpu.memory_space<smem>>
      %76 = vector.extract_strided_slice %19 {offsets = [0, 5], sizes = [16, 16], strides = [1, 1]} : vector<22x22xf32> to vector<16x16xf32>
      %77 = vector.broadcast %75 : f32 to vector<16x16xf32>
      %78 = arith.mulf %77, %76 : vector<16x16xf32>
      %79 = arith.addf %74, %78 : vector<16x16xf32>
      %80 = arith.addf %70, %79 : vector<16x16xf32>
      %c6 = arith.constant 6 : index
      %81 = memref.load %arg2[%c6] : memref<98xf32, #tpu.memory_space<smem>>
      %82 = vector.extract_strided_slice %18 {offsets = [0, 6], sizes = [16, 16], strides = [1, 1]} : vector<22x22xf32> to vector<16x16xf32>
      %83 = vector.broadcast %81 : f32 to vector<16x16xf32>
      %84 = arith.mulf %83, %82 : vector<16x16xf32>
      %c55 = arith.constant 55 : index
      %85 = memref.load %arg2[%c55] : memref<98xf32, #tpu.memory_space<smem>>
      %86 = vector.extract_strided_slice %19 {offsets = [0, 6], sizes = [16, 16], strides = [1, 1]} : vector<22x22xf32> to vector<16x16xf32>
      %87 = vector.broadcast %85 : f32 to vector<16x16xf32>
      %88 = arith.mulf %87, %86 : vector<16x16xf32>
      %89 = arith.addf %84, %88 : vector<16x16xf32>
      %90 = arith.addf %80, %89 : vector<16x16xf32>
      %c7 = arith.constant 7 : index
      %91 = memref.load %arg2[%c7] : memref<98xf32, #tpu.memory_space<smem>>
      %92 = vector.extract_strided_slice %18 {offsets = [1, 0], sizes = [16, 16], strides = [1, 1]} : vector<22x22xf32> to vector<16x16xf32>
      %93 = vector.broadcast %91 : f32 to vector<16x16xf32>
      %94 = arith.mulf %93, %92 : vector<16x16xf32>
      %c56 = arith.constant 56 : index
      %95 = memref.load %arg2[%c56] : memref<98xf32, #tpu.memory_space<smem>>
      %96 = vector.extract_strided_slice %19 {offsets = [1, 0], sizes = [16, 16], strides = [1, 1]} : vector<22x22xf32> to vector<16x16xf32>
      %97 = vector.broadcast %95 : f32 to vector<16x16xf32>
      %98 = arith.mulf %97, %96 : vector<16x16xf32>
      %99 = arith.addf %94, %98 : vector<16x16xf32>
      %100 = arith.addf %90, %99 : vector<16x16xf32>
      %c8 = arith.constant 8 : index
      %101 = memref.load %arg2[%c8] : memref<98xf32, #tpu.memory_space<smem>>
      %102 = vector.extract_strided_slice %18 {offsets = [1, 1], sizes = [16, 16], strides = [1, 1]} : vector<22x22xf32> to vector<16x16xf32>
      %103 = vector.broadcast %101 : f32 to vector<16x16xf32>
      %104 = arith.mulf %103, %102 : vector<16x16xf32>
      %c57 = arith.constant 57 : index
      %105 = memref.load %arg2[%c57] : memref<98xf32, #tpu.memory_space<smem>>
      %106 = vector.extract_strided_slice %19 {offsets = [1, 1], sizes = [16, 16], strides = [1, 1]} : vector<22x22xf32> to vector<16x16xf32>
      %107 = vector.broadcast %105 : f32 to vector<16x16xf32>
      %108 = arith.mulf %107, %106 : vector<16x16xf32>
      %109 = arith.addf %104, %108 : vector<16x16xf32>
      %110 = arith.addf %100, %109 : vector<16x16xf32>
      %c9 = arith.constant 9 : index
      %111 = memref.load %arg2[%c9] : memref<98xf32, #tpu.memory_space<smem>>
      %112 = vector.extract_strided_slice %18 {offsets = [1, 2], sizes = [16, 16], strides = [1, 1]} : vector<22x22xf32> to vector<16x16xf32>
      %113 = vector.broadcast %111 : f32 to vector<16x16xf32>
      %114 = arith.mulf %113, %112 : vector<16x16xf32>
      %c58 = arith.constant 58 : index
      %115 = memref.load %arg2[%c58] : memref<98xf32, #tpu.memory_space<smem>>
      %116 = vector.extract_strided_slice %19 {offsets = [1, 2], sizes = [16, 16], strides = [1, 1]} : vector<22x22xf32> to vector<16x16xf32>
      %117 = vector.broadcast %115 : f32 to vector<16x16xf32>
      %118 = arith.mulf %117, %116 : vector<16x16xf32>
      %119 = arith.addf %114, %118 : vector<16x16xf32>
      %120 = arith.addf %110, %119 : vector<16x16xf32>
      %c10 = arith.constant 10 : index
      %121 = memref.load %arg2[%c10] : memref<98xf32, #tpu.memory_space<smem>>
      %122 = vector.extract_strided_slice %18 {offsets = [1, 3], sizes = [16, 16], strides = [1, 1]} : vector<22x22xf32> to vector<16x16xf32>
      %123 = vector.broadcast %121 : f32 to vector<16x16xf32>
      %124 = arith.mulf %123, %122 : vector<16x16xf32>
      %c59 = arith.constant 59 : index
      %125 = memref.load %arg2[%c59] : memref<98xf32, #tpu.memory_space<smem>>
      %126 = vector.extract_strided_slice %19 {offsets = [1, 3], sizes = [16, 16], strides = [1, 1]} : vector<22x22xf32> to vector<16x16xf32>
      %127 = vector.broadcast %125 : f32 to vector<16x16xf32>
      %128 = arith.mulf %127, %126 : vector<16x16xf32>
      %129 = arith.addf %124, %128 : vector<16x16xf32>
      %130 = arith.addf %120, %129 : vector<16x16xf32>
      %c11 = arith.constant 11 : index
      %131 = memref.load %arg2[%c11] : memref<98xf32, #tpu.memory_space<smem>>
      %132 = vector.extract_strided_slice %18 {offsets = [1, 4], sizes = [16, 16], strides = [1, 1]} : vector<22x22xf32> to vector<16x16xf32>
      %133 = vector.broadcast %131 : f32 to vector<16x16xf32>
      %134 = arith.mulf %133, %132 : vector<16x16xf32>
      %c60 = arith.constant 60 : index
      %135 = memref.load %arg2[%c60] : memref<98xf32, #tpu.memory_space<smem>>
      %136 = vector.extract_strided_slice %19 {offsets = [1, 4], sizes = [16, 16], strides = [1, 1]} : vector<22x22xf32> to vector<16x16xf32>
      %137 = vector.broadcast %135 : f32 to vector<16x16xf32>
      %138 = arith.mulf %137, %136 : vector<16x16xf32>
      %139 = arith.addf %134, %138 : vector<16x16xf32>
      %140 = arith.addf %130, %139 : vector<16x16xf32>
      %c12 = arith.constant 12 : index
      %141 = memref.load %arg2[%c12] : memref<98xf32, #tpu.memory_space<smem>>
      %142 = vector.extract_strided_slice %18 {offsets = [1, 5], sizes = [16, 16], strides = [1, 1]} : vector<22x22xf32> to vector<16x16xf32>
      %143 = vector.broadcast %141 : f32 to vector<16x16xf32>
      %144 = arith.mulf %143, %142 : vector<16x16xf32>
      %c61 = arith.constant 61 : index
      %145 = memref.load %arg2[%c61] : memref<98xf32, #tpu.memory_space<smem>>
      %146 = vector.extract_strided_slice %19 {offsets = [1, 5], sizes = [16, 16], strides = [1, 1]} : vector<22x22xf32> to vector<16x16xf32>
      %147 = vector.broadcast %145 : f32 to vector<16x16xf32>
      %148 = arith.mulf %147, %146 : vector<16x16xf32>
      %149 = arith.addf %144, %148 : vector<16x16xf32>
      %150 = arith.addf %140, %149 : vector<16x16xf32>
      %c13 = arith.constant 13 : index
      %151 = memref.load %arg2[%c13] : memref<98xf32, #tpu.memory_space<smem>>
      %152 = vector.extract_strided_slice %18 {offsets = [1, 6], sizes = [16, 16], strides = [1, 1]} : vector<22x22xf32> to vector<16x16xf32>
      %153 = vector.broadcast %151 : f32 to vector<16x16xf32>
      %154 = arith.mulf %153, %152 : vector<16x16xf32>
      %c62 = arith.constant 62 : index
      %155 = memref.load %arg2[%c62] : memref<98xf32, #tpu.memory_space<smem>>
      %156 = vector.extract_strided_slice %19 {offsets = [1, 6], sizes = [16, 16], strides = [1, 1]} : vector<22x22xf32> to vector<16x16xf32>
      %157 = vector.broadcast %155 : f32 to vector<16x16xf32>
      %158 = arith.mulf %157, %156 : vector<16x16xf32>
      %159 = arith.addf %154, %158 : vector<16x16xf32>
      %160 = arith.addf %150, %159 : vector<16x16xf32>
      %c14 = arith.constant 14 : index
      %161 = memref.load %arg2[%c14] : memref<98xf32, #tpu.memory_space<smem>>
      %162 = vector.extract_strided_slice %18 {offsets = [2, 0], sizes = [16, 16], strides = [1, 1]} : vector<22x22xf32> to vector<16x16xf32>
      %163 = vector.broadcast %161 : f32 to vector<16x16xf32>
      %164 = arith.mulf %163, %162 : vector<16x16xf32>
      %c63 = arith.constant 63 : index
      %165 = memref.load %arg2[%c63] : memref<98xf32, #tpu.memory_space<smem>>
      %166 = vector.extract_strided_slice %19 {offsets = [2, 0], sizes = [16, 16], strides = [1, 1]} : vector<22x22xf32> to vector<16x16xf32>
      %167 = vector.broadcast %165 : f32 to vector<16x16xf32>
      %168 = arith.mulf %167, %166 : vector<16x16xf32>
      %169 = arith.addf %164, %168 : vector<16x16xf32>
      %170 = arith.addf %160, %169 : vector<16x16xf32>
      %c15 = arith.constant 15 : index
      %171 = memref.load %arg2[%c15] : memref<98xf32, #tpu.memory_space<smem>>
      %172 = vector.extract_strided_slice %18 {offsets = [2, 1], sizes = [16, 16], strides = [1, 1]} : vector<22x22xf32> to vector<16x16xf32>
      %173 = vector.broadcast %171 : f32 to vector<16x16xf32>
      %174 = arith.mulf %173, %172 : vector<16x16xf32>
      %c64 = arith.constant 64 : index
      %175 = memref.load %arg2[%c64] : memref<98xf32, #tpu.memory_space<smem>>
      %176 = vector.extract_strided_slice %19 {offsets = [2, 1], sizes = [16, 16], strides = [1, 1]} : vector<22x22xf32> to vector<16x16xf32>
      %177 = vector.broadcast %175 : f32 to vector<16x16xf32>
      %178 = arith.mulf %177, %176 : vector<16x16xf32>
      %179 = arith.addf %174, %178 : vector<16x16xf32>
      %180 = arith.addf %170, %179 : vector<16x16xf32>
      %c16 = arith.constant 16 : index
      %181 = memref.load %arg2[%c16] : memref<98xf32, #tpu.memory_space<smem>>
      %182 = vector.extract_strided_slice %18 {offsets = [2, 2], sizes = [16, 16], strides = [1, 1]} : vector<22x22xf32> to vector<16x16xf32>
      %183 = vector.broadcast %181 : f32 to vector<16x16xf32>
      %184 = arith.mulf %183, %182 : vector<16x16xf32>
      %c65 = arith.constant 65 : index
      %185 = memref.load %arg2[%c65] : memref<98xf32, #tpu.memory_space<smem>>
      %186 = vector.extract_strided_slice %19 {offsets = [2, 2], sizes = [16, 16], strides = [1, 1]} : vector<22x22xf32> to vector<16x16xf32>
      %187 = vector.broadcast %185 : f32 to vector<16x16xf32>
      %188 = arith.mulf %187, %186 : vector<16x16xf32>
      %189 = arith.addf %184, %188 : vector<16x16xf32>
      %190 = arith.addf %180, %189 : vector<16x16xf32>
      %c17 = arith.constant 17 : index
      %191 = memref.load %arg2[%c17] : memref<98xf32, #tpu.memory_space<smem>>
      %192 = vector.extract_strided_slice %18 {offsets = [2, 3], sizes = [16, 16], strides = [1, 1]} : vector<22x22xf32> to vector<16x16xf32>
      %193 = vector.broadcast %191 : f32 to vector<16x16xf32>
      %194 = arith.mulf %193, %192 : vector<16x16xf32>
      %c66 = arith.constant 66 : index
      %195 = memref.load %arg2[%c66] : memref<98xf32, #tpu.memory_space<smem>>
      %196 = vector.extract_strided_slice %19 {offsets = [2, 3], sizes = [16, 16], strides = [1, 1]} : vector<22x22xf32> to vector<16x16xf32>
      %197 = vector.broadcast %195 : f32 to vector<16x16xf32>
      %198 = arith.mulf %197, %196 : vector<16x16xf32>
      %199 = arith.addf %194, %198 : vector<16x16xf32>
      %200 = arith.addf %190, %199 : vector<16x16xf32>
      %c18 = arith.constant 18 : index
      %201 = memref.load %arg2[%c18] : memref<98xf32, #tpu.memory_space<smem>>
      %202 = vector.extract_strided_slice %18 {offsets = [2, 4], sizes = [16, 16], strides = [1, 1]} : vector<22x22xf32> to vector<16x16xf32>
      %203 = vector.broadcast %201 : f32 to vector<16x16xf32>
      %204 = arith.mulf %203, %202 : vector<16x16xf32>
      %c67 = arith.constant 67 : index
      %205 = memref.load %arg2[%c67] : memref<98xf32, #tpu.memory_space<smem>>
      %206 = vector.extract_strided_slice %19 {offsets = [2, 4], sizes = [16, 16], strides = [1, 1]} : vector<22x22xf32> to vector<16x16xf32>
      %207 = vector.broadcast %205 : f32 to vector<16x16xf32>
      %208 = arith.mulf %207, %206 : vector<16x16xf32>
      %209 = arith.addf %204, %208 : vector<16x16xf32>
      %210 = arith.addf %200, %209 : vector<16x16xf32>
      %c19 = arith.constant 19 : index
      %211 = memref.load %arg2[%c19] : memref<98xf32, #tpu.memory_space<smem>>
      %212 = vector.extract_strided_slice %18 {offsets = [2, 5], sizes = [16, 16], strides = [1, 1]} : vector<22x22xf32> to vector<16x16xf32>
      %213 = vector.broadcast %211 : f32 to vector<16x16xf32>
      %214 = arith.mulf %213, %212 : vector<16x16xf32>
      %c68 = arith.constant 68 : index
      %215 = memref.load %arg2[%c68] : memref<98xf32, #tpu.memory_space<smem>>
      %216 = vector.extract_strided_slice %19 {offsets = [2, 5], sizes = [16, 16], strides = [1, 1]} : vector<22x22xf32> to vector<16x16xf32>
      %217 = vector.broadcast %215 : f32 to vector<16x16xf32>
      %218 = arith.mulf %217, %216 : vector<16x16xf32>
      %219 = arith.addf %214, %218 : vector<16x16xf32>
      %220 = arith.addf %210, %219 : vector<16x16xf32>
      %c20 = arith.constant 20 : index
      %221 = memref.load %arg2[%c20] : memref<98xf32, #tpu.memory_space<smem>>
      %222 = vector.extract_strided_slice %18 {offsets = [2, 6], sizes = [16, 16], strides = [1, 1]} : vector<22x22xf32> to vector<16x16xf32>
      %223 = vector.broadcast %221 : f32 to vector<16x16xf32>
      %224 = arith.mulf %223, %222 : vector<16x16xf32>
      %c69 = arith.constant 69 : index
      %225 = memref.load %arg2[%c69] : memref<98xf32, #tpu.memory_space<smem>>
      %226 = vector.extract_strided_slice %19 {offsets = [2, 6], sizes = [16, 16], strides = [1, 1]} : vector<22x22xf32> to vector<16x16xf32>
      %227 = vector.broadcast %225 : f32 to vector<16x16xf32>
      %228 = arith.mulf %227, %226 : vector<16x16xf32>
      %229 = arith.addf %224, %228 : vector<16x16xf32>
      %230 = arith.addf %220, %229 : vector<16x16xf32>
      %c21 = arith.constant 21 : index
      %231 = memref.load %arg2[%c21] : memref<98xf32, #tpu.memory_space<smem>>
      %232 = vector.extract_strided_slice %18 {offsets = [3, 0], sizes = [16, 16], strides = [1, 1]} : vector<22x22xf32> to vector<16x16xf32>
      %233 = vector.broadcast %231 : f32 to vector<16x16xf32>
      %234 = arith.mulf %233, %232 : vector<16x16xf32>
      %c70 = arith.constant 70 : index
      %235 = memref.load %arg2[%c70] : memref<98xf32, #tpu.memory_space<smem>>
      %236 = vector.extract_strided_slice %19 {offsets = [3, 0], sizes = [16, 16], strides = [1, 1]} : vector<22x22xf32> to vector<16x16xf32>
      %237 = vector.broadcast %235 : f32 to vector<16x16xf32>
      %238 = arith.mulf %237, %236 : vector<16x16xf32>
      %239 = arith.addf %234, %238 : vector<16x16xf32>
      %240 = arith.addf %230, %239 : vector<16x16xf32>
      %c22 = arith.constant 22 : index
      %241 = memref.load %arg2[%c22] : memref<98xf32, #tpu.memory_space<smem>>
      %242 = vector.extract_strided_slice %18 {offsets = [3, 1], sizes = [16, 16], strides = [1, 1]} : vector<22x22xf32> to vector<16x16xf32>
      %243 = vector.broadcast %241 : f32 to vector<16x16xf32>
      %244 = arith.mulf %243, %242 : vector<16x16xf32>
      %c71 = arith.constant 71 : index
      %245 = memref.load %arg2[%c71] : memref<98xf32, #tpu.memory_space<smem>>
      %246 = vector.extract_strided_slice %19 {offsets = [3, 1], sizes = [16, 16], strides = [1, 1]} : vector<22x22xf32> to vector<16x16xf32>
      %247 = vector.broadcast %245 : f32 to vector<16x16xf32>
      %248 = arith.mulf %247, %246 : vector<16x16xf32>
      %249 = arith.addf %244, %248 : vector<16x16xf32>
      %250 = arith.addf %240, %249 : vector<16x16xf32>
      %c23 = arith.constant 23 : index
      %251 = memref.load %arg2[%c23] : memref<98xf32, #tpu.memory_space<smem>>
      %252 = vector.extract_strided_slice %18 {offsets = [3, 2], sizes = [16, 16], strides = [1, 1]} : vector<22x22xf32> to vector<16x16xf32>
      %253 = vector.broadcast %251 : f32 to vector<16x16xf32>
      %254 = arith.mulf %253, %252 : vector<16x16xf32>
      %c72 = arith.constant 72 : index
      %255 = memref.load %arg2[%c72] : memref<98xf32, #tpu.memory_space<smem>>
      %256 = vector.extract_strided_slice %19 {offsets = [3, 2], sizes = [16, 16], strides = [1, 1]} : vector<22x22xf32> to vector<16x16xf32>
      %257 = vector.broadcast %255 : f32 to vector<16x16xf32>
      %258 = arith.mulf %257, %256 : vector<16x16xf32>
      %259 = arith.addf %254, %258 : vector<16x16xf32>
      %260 = arith.addf %250, %259 : vector<16x16xf32>
      %c24 = arith.constant 24 : index
      %261 = memref.load %arg2[%c24] : memref<98xf32, #tpu.memory_space<smem>>
      %262 = vector.extract_strided_slice %18 {offsets = [3, 3], sizes = [16, 16], strides = [1, 1]} : vector<22x22xf32> to vector<16x16xf32>
      %263 = vector.broadcast %261 : f32 to vector<16x16xf32>
      %264 = arith.mulf %263, %262 : vector<16x16xf32>
      %c73 = arith.constant 73 : index
      %265 = memref.load %arg2[%c73] : memref<98xf32, #tpu.memory_space<smem>>
      %266 = vector.extract_strided_slice %19 {offsets = [3, 3], sizes = [16, 16], strides = [1, 1]} : vector<22x22xf32> to vector<16x16xf32>
      %267 = vector.broadcast %265 : f32 to vector<16x16xf32>
      %268 = arith.mulf %267, %266 : vector<16x16xf32>
      %269 = arith.addf %264, %268 : vector<16x16xf32>
      %270 = arith.addf %260, %269 : vector<16x16xf32>
      %c25 = arith.constant 25 : index
      %271 = memref.load %arg2[%c25] : memref<98xf32, #tpu.memory_space<smem>>
      %272 = vector.extract_strided_slice %18 {offsets = [3, 4], sizes = [16, 16], strides = [1, 1]} : vector<22x22xf32> to vector<16x16xf32>
      %273 = vector.broadcast %271 : f32 to vector<16x16xf32>
      %274 = arith.mulf %273, %272 : vector<16x16xf32>
      %c74 = arith.constant 74 : index
      %275 = memref.load %arg2[%c74] : memref<98xf32, #tpu.memory_space<smem>>
      %276 = vector.extract_strided_slice %19 {offsets = [3, 4], sizes = [16, 16], strides = [1, 1]} : vector<22x22xf32> to vector<16x16xf32>
      %277 = vector.broadcast %275 : f32 to vector<16x16xf32>
      %278 = arith.mulf %277, %276 : vector<16x16xf32>
      %279 = arith.addf %274, %278 : vector<16x16xf32>
      %280 = arith.addf %270, %279 : vector<16x16xf32>
      %c26 = arith.constant 26 : index
      %281 = memref.load %arg2[%c26] : memref<98xf32, #tpu.memory_space<smem>>
      %282 = vector.extract_strided_slice %18 {offsets = [3, 5], sizes = [16, 16], strides = [1, 1]} : vector<22x22xf32> to vector<16x16xf32>
      %283 = vector.broadcast %281 : f32 to vector<16x16xf32>
      %284 = arith.mulf %283, %282 : vector<16x16xf32>
      %c75 = arith.constant 75 : index
      %285 = memref.load %arg2[%c75] : memref<98xf32, #tpu.memory_space<smem>>
      %286 = vector.extract_strided_slice %19 {offsets = [3, 5], sizes = [16, 16], strides = [1, 1]} : vector<22x22xf32> to vector<16x16xf32>
      %287 = vector.broadcast %285 : f32 to vector<16x16xf32>
      %288 = arith.mulf %287, %286 : vector<16x16xf32>
      %289 = arith.addf %284, %288 : vector<16x16xf32>
      %290 = arith.addf %280, %289 : vector<16x16xf32>
      %c27 = arith.constant 27 : index
      %291 = memref.load %arg2[%c27] : memref<98xf32, #tpu.memory_space<smem>>
      %292 = vector.extract_strided_slice %18 {offsets = [3, 6], sizes = [16, 16], strides = [1, 1]} : vector<22x22xf32> to vector<16x16xf32>
      %293 = vector.broadcast %291 : f32 to vector<16x16xf32>
      %294 = arith.mulf %293, %292 : vector<16x16xf32>
      %c76 = arith.constant 76 : index
      %295 = memref.load %arg2[%c76] : memref<98xf32, #tpu.memory_space<smem>>
      %296 = vector.extract_strided_slice %19 {offsets = [3, 6], sizes = [16, 16], strides = [1, 1]} : vector<22x22xf32> to vector<16x16xf32>
      %297 = vector.broadcast %295 : f32 to vector<16x16xf32>
      %298 = arith.mulf %297, %296 : vector<16x16xf32>
      %299 = arith.addf %294, %298 : vector<16x16xf32>
      %300 = arith.addf %290, %299 : vector<16x16xf32>
      %c28 = arith.constant 28 : index
      %301 = memref.load %arg2[%c28] : memref<98xf32, #tpu.memory_space<smem>>
      %302 = vector.extract_strided_slice %18 {offsets = [4, 0], sizes = [16, 16], strides = [1, 1]} : vector<22x22xf32> to vector<16x16xf32>
      %303 = vector.broadcast %301 : f32 to vector<16x16xf32>
      %304 = arith.mulf %303, %302 : vector<16x16xf32>
      %c77 = arith.constant 77 : index
      %305 = memref.load %arg2[%c77] : memref<98xf32, #tpu.memory_space<smem>>
      %306 = vector.extract_strided_slice %19 {offsets = [4, 0], sizes = [16, 16], strides = [1, 1]} : vector<22x22xf32> to vector<16x16xf32>
      %307 = vector.broadcast %305 : f32 to vector<16x16xf32>
      %308 = arith.mulf %307, %306 : vector<16x16xf32>
      %309 = arith.addf %304, %308 : vector<16x16xf32>
      %310 = arith.addf %300, %309 : vector<16x16xf32>
      %c29 = arith.constant 29 : index
      %311 = memref.load %arg2[%c29] : memref<98xf32, #tpu.memory_space<smem>>
      %312 = vector.extract_strided_slice %18 {offsets = [4, 1], sizes = [16, 16], strides = [1, 1]} : vector<22x22xf32> to vector<16x16xf32>
      %313 = vector.broadcast %311 : f32 to vector<16x16xf32>
      %314 = arith.mulf %313, %312 : vector<16x16xf32>
      %c78 = arith.constant 78 : index
      %315 = memref.load %arg2[%c78] : memref<98xf32, #tpu.memory_space<smem>>
      %316 = vector.extract_strided_slice %19 {offsets = [4, 1], sizes = [16, 16], strides = [1, 1]} : vector<22x22xf32> to vector<16x16xf32>
      %317 = vector.broadcast %315 : f32 to vector<16x16xf32>
      %318 = arith.mulf %317, %316 : vector<16x16xf32>
      %319 = arith.addf %314, %318 : vector<16x16xf32>
      %320 = arith.addf %310, %319 : vector<16x16xf32>
      %c30 = arith.constant 30 : index
      %321 = memref.load %arg2[%c30] : memref<98xf32, #tpu.memory_space<smem>>
      %322 = vector.extract_strided_slice %18 {offsets = [4, 2], sizes = [16, 16], strides = [1, 1]} : vector<22x22xf32> to vector<16x16xf32>
      %323 = vector.broadcast %321 : f32 to vector<16x16xf32>
      %324 = arith.mulf %323, %322 : vector<16x16xf32>
      %c79 = arith.constant 79 : index
      %325 = memref.load %arg2[%c79] : memref<98xf32, #tpu.memory_space<smem>>
      %326 = vector.extract_strided_slice %19 {offsets = [4, 2], sizes = [16, 16], strides = [1, 1]} : vector<22x22xf32> to vector<16x16xf32>
      %327 = vector.broadcast %325 : f32 to vector<16x16xf32>
      %328 = arith.mulf %327, %326 : vector<16x16xf32>
      %329 = arith.addf %324, %328 : vector<16x16xf32>
      %330 = arith.addf %320, %329 : vector<16x16xf32>
      %c31 = arith.constant 31 : index
      %331 = memref.load %arg2[%c31] : memref<98xf32, #tpu.memory_space<smem>>
      %332 = vector.extract_strided_slice %18 {offsets = [4, 3], sizes = [16, 16], strides = [1, 1]} : vector<22x22xf32> to vector<16x16xf32>
      %333 = vector.broadcast %331 : f32 to vector<16x16xf32>
      %334 = arith.mulf %333, %332 : vector<16x16xf32>
      %c80 = arith.constant 80 : index
      %335 = memref.load %arg2[%c80] : memref<98xf32, #tpu.memory_space<smem>>
      %336 = vector.extract_strided_slice %19 {offsets = [4, 3], sizes = [16, 16], strides = [1, 1]} : vector<22x22xf32> to vector<16x16xf32>
      %337 = vector.broadcast %335 : f32 to vector<16x16xf32>
      %338 = arith.mulf %337, %336 : vector<16x16xf32>
      %339 = arith.addf %334, %338 : vector<16x16xf32>
      %340 = arith.addf %330, %339 : vector<16x16xf32>
      %c32 = arith.constant 32 : index
      %341 = memref.load %arg2[%c32] : memref<98xf32, #tpu.memory_space<smem>>
      %342 = vector.extract_strided_slice %18 {offsets = [4, 4], sizes = [16, 16], strides = [1, 1]} : vector<22x22xf32> to vector<16x16xf32>
      %343 = vector.broadcast %341 : f32 to vector<16x16xf32>
      %344 = arith.mulf %343, %342 : vector<16x16xf32>
      %c81 = arith.constant 81 : index
      %345 = memref.load %arg2[%c81] : memref<98xf32, #tpu.memory_space<smem>>
      %346 = vector.extract_strided_slice %19 {offsets = [4, 4], sizes = [16, 16], strides = [1, 1]} : vector<22x22xf32> to vector<16x16xf32>
      %347 = vector.broadcast %345 : f32 to vector<16x16xf32>
      %348 = arith.mulf %347, %346 : vector<16x16xf32>
      %349 = arith.addf %344, %348 : vector<16x16xf32>
      %350 = arith.addf %340, %349 : vector<16x16xf32>
      %c33 = arith.constant 33 : index
      %351 = memref.load %arg2[%c33] : memref<98xf32, #tpu.memory_space<smem>>
      %352 = vector.extract_strided_slice %18 {offsets = [4, 5], sizes = [16, 16], strides = [1, 1]} : vector<22x22xf32> to vector<16x16xf32>
      %353 = vector.broadcast %351 : f32 to vector<16x16xf32>
      %354 = arith.mulf %353, %352 : vector<16x16xf32>
      %c82 = arith.constant 82 : index
      %355 = memref.load %arg2[%c82] : memref<98xf32, #tpu.memory_space<smem>>
      %356 = vector.extract_strided_slice %19 {offsets = [4, 5], sizes = [16, 16], strides = [1, 1]} : vector<22x22xf32> to vector<16x16xf32>
      %357 = vector.broadcast %355 : f32 to vector<16x16xf32>
      %358 = arith.mulf %357, %356 : vector<16x16xf32>
      %359 = arith.addf %354, %358 : vector<16x16xf32>
      %360 = arith.addf %350, %359 : vector<16x16xf32>
      %c34 = arith.constant 34 : index
      %361 = memref.load %arg2[%c34] : memref<98xf32, #tpu.memory_space<smem>>
      %362 = vector.extract_strided_slice %18 {offsets = [4, 6], sizes = [16, 16], strides = [1, 1]} : vector<22x22xf32> to vector<16x16xf32>
      %363 = vector.broadcast %361 : f32 to vector<16x16xf32>
      %364 = arith.mulf %363, %362 : vector<16x16xf32>
      %c83 = arith.constant 83 : index
      %365 = memref.load %arg2[%c83] : memref<98xf32, #tpu.memory_space<smem>>
      %366 = vector.extract_strided_slice %19 {offsets = [4, 6], sizes = [16, 16], strides = [1, 1]} : vector<22x22xf32> to vector<16x16xf32>
      %367 = vector.broadcast %365 : f32 to vector<16x16xf32>
      %368 = arith.mulf %367, %366 : vector<16x16xf32>
      %369 = arith.addf %364, %368 : vector<16x16xf32>
      %370 = arith.addf %360, %369 : vector<16x16xf32>
      %c35 = arith.constant 35 : index
      %371 = memref.load %arg2[%c35] : memref<98xf32, #tpu.memory_space<smem>>
      %372 = vector.extract_strided_slice %18 {offsets = [5, 0], sizes = [16, 16], strides = [1, 1]} : vector<22x22xf32> to vector<16x16xf32>
      %373 = vector.broadcast %371 : f32 to vector<16x16xf32>
      %374 = arith.mulf %373, %372 : vector<16x16xf32>
      %c84 = arith.constant 84 : index
      %375 = memref.load %arg2[%c84] : memref<98xf32, #tpu.memory_space<smem>>
      %376 = vector.extract_strided_slice %19 {offsets = [5, 0], sizes = [16, 16], strides = [1, 1]} : vector<22x22xf32> to vector<16x16xf32>
      %377 = vector.broadcast %375 : f32 to vector<16x16xf32>
      %378 = arith.mulf %377, %376 : vector<16x16xf32>
      %379 = arith.addf %374, %378 : vector<16x16xf32>
      %380 = arith.addf %370, %379 : vector<16x16xf32>
      %c36 = arith.constant 36 : index
      %381 = memref.load %arg2[%c36] : memref<98xf32, #tpu.memory_space<smem>>
      %382 = vector.extract_strided_slice %18 {offsets = [5, 1], sizes = [16, 16], strides = [1, 1]} : vector<22x22xf32> to vector<16x16xf32>
      %383 = vector.broadcast %381 : f32 to vector<16x16xf32>
      %384 = arith.mulf %383, %382 : vector<16x16xf32>
      %c85 = arith.constant 85 : index
      %385 = memref.load %arg2[%c85] : memref<98xf32, #tpu.memory_space<smem>>
      %386 = vector.extract_strided_slice %19 {offsets = [5, 1], sizes = [16, 16], strides = [1, 1]} : vector<22x22xf32> to vector<16x16xf32>
      %387 = vector.broadcast %385 : f32 to vector<16x16xf32>
      %388 = arith.mulf %387, %386 : vector<16x16xf32>
      %389 = arith.addf %384, %388 : vector<16x16xf32>
      %390 = arith.addf %380, %389 : vector<16x16xf32>
      %c37 = arith.constant 37 : index
      %391 = memref.load %arg2[%c37] : memref<98xf32, #tpu.memory_space<smem>>
      %392 = vector.extract_strided_slice %18 {offsets = [5, 2], sizes = [16, 16], strides = [1, 1]} : vector<22x22xf32> to vector<16x16xf32>
      %393 = vector.broadcast %391 : f32 to vector<16x16xf32>
      %394 = arith.mulf %393, %392 : vector<16x16xf32>
      %c86 = arith.constant 86 : index
      %395 = memref.load %arg2[%c86] : memref<98xf32, #tpu.memory_space<smem>>
      %396 = vector.extract_strided_slice %19 {offsets = [5, 2], sizes = [16, 16], strides = [1, 1]} : vector<22x22xf32> to vector<16x16xf32>
      %397 = vector.broadcast %395 : f32 to vector<16x16xf32>
      %398 = arith.mulf %397, %396 : vector<16x16xf32>
      %399 = arith.addf %394, %398 : vector<16x16xf32>
      %400 = arith.addf %390, %399 : vector<16x16xf32>
      %c38 = arith.constant 38 : index
      %401 = memref.load %arg2[%c38] : memref<98xf32, #tpu.memory_space<smem>>
      %402 = vector.extract_strided_slice %18 {offsets = [5, 3], sizes = [16, 16], strides = [1, 1]} : vector<22x22xf32> to vector<16x16xf32>
      %403 = vector.broadcast %401 : f32 to vector<16x16xf32>
      %404 = arith.mulf %403, %402 : vector<16x16xf32>
      %c87 = arith.constant 87 : index
      %405 = memref.load %arg2[%c87] : memref<98xf32, #tpu.memory_space<smem>>
      %406 = vector.extract_strided_slice %19 {offsets = [5, 3], sizes = [16, 16], strides = [1, 1]} : vector<22x22xf32> to vector<16x16xf32>
      %407 = vector.broadcast %405 : f32 to vector<16x16xf32>
      %408 = arith.mulf %407, %406 : vector<16x16xf32>
      %409 = arith.addf %404, %408 : vector<16x16xf32>
      %410 = arith.addf %400, %409 : vector<16x16xf32>
      %c39 = arith.constant 39 : index
      %411 = memref.load %arg2[%c39] : memref<98xf32, #tpu.memory_space<smem>>
      %412 = vector.extract_strided_slice %18 {offsets = [5, 4], sizes = [16, 16], strides = [1, 1]} : vector<22x22xf32> to vector<16x16xf32>
      %413 = vector.broadcast %411 : f32 to vector<16x16xf32>
      %414 = arith.mulf %413, %412 : vector<16x16xf32>
      %c88 = arith.constant 88 : index
      %415 = memref.load %arg2[%c88] : memref<98xf32, #tpu.memory_space<smem>>
      %416 = vector.extract_strided_slice %19 {offsets = [5, 4], sizes = [16, 16], strides = [1, 1]} : vector<22x22xf32> to vector<16x16xf32>
      %417 = vector.broadcast %415 : f32 to vector<16x16xf32>
      %418 = arith.mulf %417, %416 : vector<16x16xf32>
      %419 = arith.addf %414, %418 : vector<16x16xf32>
      %420 = arith.addf %410, %419 : vector<16x16xf32>
      %c40 = arith.constant 40 : index
      %421 = memref.load %arg2[%c40] : memref<98xf32, #tpu.memory_space<smem>>
      %422 = vector.extract_strided_slice %18 {offsets = [5, 5], sizes = [16, 16], strides = [1, 1]} : vector<22x22xf32> to vector<16x16xf32>
      %423 = vector.broadcast %421 : f32 to vector<16x16xf32>
      %424 = arith.mulf %423, %422 : vector<16x16xf32>
      %c89 = arith.constant 89 : index
      %425 = memref.load %arg2[%c89] : memref<98xf32, #tpu.memory_space<smem>>
      %426 = vector.extract_strided_slice %19 {offsets = [5, 5], sizes = [16, 16], strides = [1, 1]} : vector<22x22xf32> to vector<16x16xf32>
      %427 = vector.broadcast %425 : f32 to vector<16x16xf32>
      %428 = arith.mulf %427, %426 : vector<16x16xf32>
      %429 = arith.addf %424, %428 : vector<16x16xf32>
      %430 = arith.addf %420, %429 : vector<16x16xf32>
      %c41 = arith.constant 41 : index
      %431 = memref.load %arg2[%c41] : memref<98xf32, #tpu.memory_space<smem>>
      %432 = vector.extract_strided_slice %18 {offsets = [5, 6], sizes = [16, 16], strides = [1, 1]} : vector<22x22xf32> to vector<16x16xf32>
      %433 = vector.broadcast %431 : f32 to vector<16x16xf32>
      %434 = arith.mulf %433, %432 : vector<16x16xf32>
      %c90 = arith.constant 90 : index
      %435 = memref.load %arg2[%c90] : memref<98xf32, #tpu.memory_space<smem>>
      %436 = vector.extract_strided_slice %19 {offsets = [5, 6], sizes = [16, 16], strides = [1, 1]} : vector<22x22xf32> to vector<16x16xf32>
      %437 = vector.broadcast %435 : f32 to vector<16x16xf32>
      %438 = arith.mulf %437, %436 : vector<16x16xf32>
      %439 = arith.addf %434, %438 : vector<16x16xf32>
      %440 = arith.addf %430, %439 : vector<16x16xf32>
      %c42 = arith.constant 42 : index
      %441 = memref.load %arg2[%c42] : memref<98xf32, #tpu.memory_space<smem>>
      %442 = vector.extract_strided_slice %18 {offsets = [6, 0], sizes = [16, 16], strides = [1, 1]} : vector<22x22xf32> to vector<16x16xf32>
      %443 = vector.broadcast %441 : f32 to vector<16x16xf32>
      %444 = arith.mulf %443, %442 : vector<16x16xf32>
      %c91 = arith.constant 91 : index
      %445 = memref.load %arg2[%c91] : memref<98xf32, #tpu.memory_space<smem>>
      %446 = vector.extract_strided_slice %19 {offsets = [6, 0], sizes = [16, 16], strides = [1, 1]} : vector<22x22xf32> to vector<16x16xf32>
      %447 = vector.broadcast %445 : f32 to vector<16x16xf32>
      %448 = arith.mulf %447, %446 : vector<16x16xf32>
      %449 = arith.addf %444, %448 : vector<16x16xf32>
      %450 = arith.addf %440, %449 : vector<16x16xf32>
      %c43 = arith.constant 43 : index
      %451 = memref.load %arg2[%c43] : memref<98xf32, #tpu.memory_space<smem>>
      %452 = vector.extract_strided_slice %18 {offsets = [6, 1], sizes = [16, 16], strides = [1, 1]} : vector<22x22xf32> to vector<16x16xf32>
      %453 = vector.broadcast %451 : f32 to vector<16x16xf32>
      %454 = arith.mulf %453, %452 : vector<16x16xf32>
      %c92 = arith.constant 92 : index
      %455 = memref.load %arg2[%c92] : memref<98xf32, #tpu.memory_space<smem>>
      %456 = vector.extract_strided_slice %19 {offsets = [6, 1], sizes = [16, 16], strides = [1, 1]} : vector<22x22xf32> to vector<16x16xf32>
      %457 = vector.broadcast %455 : f32 to vector<16x16xf32>
      %458 = arith.mulf %457, %456 : vector<16x16xf32>
      %459 = arith.addf %454, %458 : vector<16x16xf32>
      %460 = arith.addf %450, %459 : vector<16x16xf32>
      %c44 = arith.constant 44 : index
      %461 = memref.load %arg2[%c44] : memref<98xf32, #tpu.memory_space<smem>>
      %462 = vector.extract_strided_slice %18 {offsets = [6, 2], sizes = [16, 16], strides = [1, 1]} : vector<22x22xf32> to vector<16x16xf32>
      %463 = vector.broadcast %461 : f32 to vector<16x16xf32>
      %464 = arith.mulf %463, %462 : vector<16x16xf32>
      %c93 = arith.constant 93 : index
      %465 = memref.load %arg2[%c93] : memref<98xf32, #tpu.memory_space<smem>>
      %466 = vector.extract_strided_slice %19 {offsets = [6, 2], sizes = [16, 16], strides = [1, 1]} : vector<22x22xf32> to vector<16x16xf32>
      %467 = vector.broadcast %465 : f32 to vector<16x16xf32>
      %468 = arith.mulf %467, %466 : vector<16x16xf32>
      %469 = arith.addf %464, %468 : vector<16x16xf32>
      %470 = arith.addf %460, %469 : vector<16x16xf32>
      %c45 = arith.constant 45 : index
      %471 = memref.load %arg2[%c45] : memref<98xf32, #tpu.memory_space<smem>>
      %472 = vector.extract_strided_slice %18 {offsets = [6, 3], sizes = [16, 16], strides = [1, 1]} : vector<22x22xf32> to vector<16x16xf32>
      %473 = vector.broadcast %471 : f32 to vector<16x16xf32>
      %474 = arith.mulf %473, %472 : vector<16x16xf32>
      %c94 = arith.constant 94 : index
      %475 = memref.load %arg2[%c94] : memref<98xf32, #tpu.memory_space<smem>>
      %476 = vector.extract_strided_slice %19 {offsets = [6, 3], sizes = [16, 16], strides = [1, 1]} : vector<22x22xf32> to vector<16x16xf32>
      %477 = vector.broadcast %475 : f32 to vector<16x16xf32>
      %478 = arith.mulf %477, %476 : vector<16x16xf32>
      %479 = arith.addf %474, %478 : vector<16x16xf32>
      %480 = arith.addf %470, %479 : vector<16x16xf32>
      %c46 = arith.constant 46 : index
      %481 = memref.load %arg2[%c46] : memref<98xf32, #tpu.memory_space<smem>>
      %482 = vector.extract_strided_slice %18 {offsets = [6, 4], sizes = [16, 16], strides = [1, 1]} : vector<22x22xf32> to vector<16x16xf32>
      %483 = vector.broadcast %481 : f32 to vector<16x16xf32>
      %484 = arith.mulf %483, %482 : vector<16x16xf32>
      %c95 = arith.constant 95 : index
      %485 = memref.load %arg2[%c95] : memref<98xf32, #tpu.memory_space<smem>>
      %486 = vector.extract_strided_slice %19 {offsets = [6, 4], sizes = [16, 16], strides = [1, 1]} : vector<22x22xf32> to vector<16x16xf32>
      %487 = vector.broadcast %485 : f32 to vector<16x16xf32>
      %488 = arith.mulf %487, %486 : vector<16x16xf32>
      %489 = arith.addf %484, %488 : vector<16x16xf32>
      %490 = arith.addf %480, %489 : vector<16x16xf32>
      %c47 = arith.constant 47 : index
      %491 = memref.load %arg2[%c47] : memref<98xf32, #tpu.memory_space<smem>>
      %492 = vector.extract_strided_slice %18 {offsets = [6, 5], sizes = [16, 16], strides = [1, 1]} : vector<22x22xf32> to vector<16x16xf32>
      %493 = vector.broadcast %491 : f32 to vector<16x16xf32>
      %494 = arith.mulf %493, %492 : vector<16x16xf32>
      %c96 = arith.constant 96 : index
      %495 = memref.load %arg2[%c96] : memref<98xf32, #tpu.memory_space<smem>>
      %496 = vector.extract_strided_slice %19 {offsets = [6, 5], sizes = [16, 16], strides = [1, 1]} : vector<22x22xf32> to vector<16x16xf32>
      %497 = vector.broadcast %495 : f32 to vector<16x16xf32>
      %498 = arith.mulf %497, %496 : vector<16x16xf32>
      %499 = arith.addf %494, %498 : vector<16x16xf32>
      %500 = arith.addf %490, %499 : vector<16x16xf32>
      %c48 = arith.constant 48 : index
      %501 = memref.load %arg2[%c48] : memref<98xf32, #tpu.memory_space<smem>>
      %502 = vector.extract_strided_slice %18 {offsets = [6, 6], sizes = [16, 16], strides = [1, 1]} : vector<22x22xf32> to vector<16x16xf32>
      %503 = vector.broadcast %501 : f32 to vector<16x16xf32>
      %504 = arith.mulf %503, %502 : vector<16x16xf32>
      %c97 = arith.constant 97 : index
      %505 = memref.load %arg2[%c97] : memref<98xf32, #tpu.memory_space<smem>>
      %506 = vector.extract_strided_slice %19 {offsets = [6, 6], sizes = [16, 16], strides = [1, 1]} : vector<22x22xf32> to vector<16x16xf32>
      %507 = vector.broadcast %505 : f32 to vector<16x16xf32>
      %508 = arith.mulf %507, %506 : vector<16x16xf32>
      %509 = arith.addf %504, %508 : vector<16x16xf32>
      %510 = arith.addf %500, %509 : vector<16x16xf32>
      %511 = arith.negf %510 : vector<16x16xf32>
      %512 = math.exp %511 : vector<16x16xf32>
      %cst_21 = arith.constant 1.000000e+00 : f32
      %513 = vector.broadcast %cst_21 : f32 to vector<16x16xf32>
      %514 = arith.addf %513, %512 : vector<16x16xf32>
      %515 = arith.divf %513, %514 : vector<16x16xf32>
      %c0_22 = arith.constant 0 : index
      %c0_23 = arith.constant 0 : index
      %c0_24 = arith.constant 0 : index
      %c0_25 = arith.constant 0 : index
      %516 = vector.load %arg4[%c0_22, %c0_23, %c0_24, %c0_25] : memref<1x1x16x16xf32, #tpu.memory_space<vmem>>, vector<1x1x16x16xf32>
      %517 = vector.shape_cast %516 : vector<1x1x16x16xf32> to vector<16x16xf32>
      %518 = vector.shape_cast %515 : vector<16x16xf32> to vector<1x1x16x16xf32>
      tpu.vector_store %arg4[%c0_22, %c0_23, %c0_24, %c0_25], %518 {strides = array<i32>} : memref<1x1x16x16xf32, #tpu.memory_space<vmem>>, vector<1x1x16x16xf32>,
    } else {
    }
    return
  }
  func.func @transform_0(%arg0: i32, %arg1: i32) -> i32 {
    %c0_i32 = arith.constant 0 : i32
    %c0_i32_0 = arith.constant 0 : i32
    return %c0_i32 : i32
  }
  func.func @transform_1(%arg0: i32, %arg1: i32) -> (i32, i32, i32, i32) {
    %c0_i32 = arith.constant 0 : i32
    %c0_i32_0 = arith.constant 0 : i32
    %c0_i32_1 = arith.constant 0 : i32
    return %arg0, %arg1, %c0_i32, %c0_i32_0 : i32, i32, i32, i32
  }
  func.func @transform_2(%arg0: i32, %arg1: i32) -> (i32, i32, i32, i32) {
    %c0_i32 = arith.constant 0 : i32
    %c0_i32_0 = arith.constant 0 : i32
    %c0_i32_1 = arith.constant 0 : i32
    %c0_i32_2 = arith.constant 0 : i32
    return %arg0, %c0_i32, %c0_i32_0, %c0_i32_1 : i32, i32, i32, i32
  }
}

</mosaic_0001>

<bundles_post_ra>
// kernel: tpu_custom_call.1
= control target key start
LH: loop header
LB: loop body
LE: loop exit
PB: predicated region body
PF: predicated region fallthrough
CT: control target
= control target key end

     0   :  { %7 = vsyncpa [#allocation6], 0  ;;  %s3325_s0 = inlined_call_operand.vmem [shape: f32[98], index: 0, kind: input, shape index: {}]   ;;  %s3326_s1 = inlined_call_operand.vmem [shape: f32[2,16,22,22], index: 1, kind: input, shape index: {}]   ;;  %s3327_s2 = inlined_call_operand.hbm [shape: f32[2,1,16,16], index: 2, kind: output, shape index: {}]  }
   0x1   :  { %8 = vsyncpa [#allocation5], 0 }
   0x2   :  { %10 = vsyncpa [#allocation5 + $0x1], 0  ;;  %s2167_s9 = smov 0   ;;  %s2169_s10 = smov 0  }
   0x3   :  { %s2171_s11 = smov 0   ;;  %s2173_s12 = smov 0  }
   0x4   :  { %s2175_s13 = smov 0   ;;  %s2177_s14 = smov 0  }
   0x5   :  { %s2179_s15 = smov 0   ;;  %s2181_s16 = smov 0  }
   0x6 LB: > { %s1801_s17 = sadd.s32 4294967295, %s2138_s16   ;;  %s1802_s18 = sadd.s32 4294967294, %s2138_s16   ;;  %s2138_s16 = sphi %s2181_s16, %s16_s16   ;;  %s2134_s15 = sphi %s2179_s15, %s3339_s15   ;;  %s2130_s14 = sphi %s2177_s14, %s3338_s14   ;;  %s2126_s13 = sphi %s2175_s13, %s3337_s13   ;;  %s2122_s12 = sphi %s2173_s12, %s3336_s12   ;;  %s2118_s11 = sphi %s2171_s11, %s3335_s11   ;;  %s2114_s10 = sphi %s2169_s10, %s3334_s10   ;;  %s2110_s9 = sphi %s2167_s9, %s3333_s9  }
   0x7   : > { %s25_s19 = sadd.s32 1, %s2130_s14  ;;  %s28_s20 = sadd.s32 1, %s2134_s15 }
   0x8   : > { %p26_p0 = scmp.ge.s32.totalorder %s25_s19, 2  ;;  %s84_s21 = sadd.s32 1, %s2118_s11 }
   0x9   : > { %p94_p1 = scmp.ne.s32.totalorder %s2118_s11, %s2114_s10  ;;  %p95_p2 = scmp.eq.s32.totalorder %s1801_s17, 3 }
   0xa   : > { %s3341_s19 = smov (%p26_p0, %s25_s19), 0  ;;  %s3343_s20 = smov (!%p26_p0, %s28_s20), %s2134_s15 }
   0xb   : > { %p2217_p3 = por %p95_p2, %p94_p1  ;;  %p100_p4 = scmp.ne.s32.totalorder %s2114_s10, %s2110_s9 }
   0xc   : > { %p30_p5 = scmp.ge.s32.totalorder %s3343_s20, 2  ;;  %p101_p6 = scmp.eq.s32.totalorder %s1802_s18, 3 }
   0xd   : > { %p1803_p7 = scmp.ge.s32.totalorder %s2138_s16, 1  ;;  %p108_p8 = scmp.lt.s32.totalorder %s2138_s16, 5 }
   0xe   : > { %s3345_s20 = smov (%p30_p5, %s3343_s20), 0  ;;  %p2227_p9 = por %p101_p6, %p100_p4 }
   0xf   : > { %p2231_p10 = pnand %p1803_p7, %p108_p8  ;;  %s81_s25 = ssub.s32 %s2134_s15, %s3345_s20 }
  0x10   : > { %s3329_s23 = scalar_select %p2227_p9, 1, 0 }
  0x11   : > { %p82_p11 = scmp.eq.s32.totalorder %s81_s25, 0  ;;  %p1926_p12 = pneg %p2231_p10 }
  0x12   : > { %p2239_p13 = scmp.eq.s32.totalorder %s1801_s17, 0  ;;  %s121_s29 = sshll.u32 %s3325_s0, 4  ;;  %s122_s29 = int_to_ptr.vmem [resolvable:$true] %s121_s29 }
  0x13   : > { %s2247_s30 = scalar_select %p82_p11, %s2118_s11, %s84_s21  }
  0x14   : > { %p1927_p0 = pnand %p2239_p13, %p1926_p12  ;;  %s2025_s3 = scalar_lea.vmem %s122_s29, 16 }
  0x15   : > { %p2026_p1 = scmp.ne.s32.totalorder %s122_s29, %s2025_s3  ;;  %p2033_p6 = scmp.lt.s32.totalorder %s122_s29, %s122_s29 }
  0x16   : > { %p2027_p2 = pneg %p1927_p0  ;;  %p2034_p7 = scmp.lt.s32.totalorder %s2025_s3, %s2025_s3 }
  0x18   : > { %p2028_p4 = pnand %p2027_p2, %p2026_p1  ;;  %p2035_p8 = por %p2034_p7, %p2033_p6 }
  0x1a   : > { %p2029_p5 = pneg %p2028_p4 }
  0x1c   : > { %p2036_p9 = pnand %p2035_p8, %p2029_p5 }
  0x1e   : > { %2039 = shalt.err (!%p2036_p9)
}
  0x1f   : > { %s2140_s4 = smov [#allocation4]   ;;  %148 = sbr.rel (%p2231_p10) target bundleno = 426 (0x1aa), region = 28 }
  0x20   : > { %1929 = dma.vmem_to_smem (!%p1927_p0), %s122_s29, 16, %s2140_s4, [#allocation6]  }
  0x26   : > { %2101 = dma.done.wait (%p2239_p13), [#allocation6], 16  }
  0x27   : > { %2103 = vsyncadd (%p2239_p13), [#allocation6], 4294967280 }
  0x28   : > { %154 = sfence }
  0x29   : > { %s173_s5 = sand.u32 1, %s2114_s10   ;;  %s1809_s6 = sshll.u32 %s2122_s12, 3 }
  0x2a   : > { %s1808_s7 = sshll.u32 %s173_s5, 4  ;;  %p177_p9 = scmp.lt.s32.totalorder %s2126_s13, 1 }
  0x2b   : > { %p179_p11 = scmp.lt.s32.totalorder %s1809_s6, 15  ;;  %s2268_s28 = scalar_lea.vmem [#allocation7], %s1808_s7 }
  0x2c   : > { %s178_s8 = scalar_select %p177_p9, %s2126_s13, 1 }
  0x2d   : > { %s3347_s6 = smov (!%p179_p11, %s1809_s6), 15  ;;  %p1811_p10 = scmp.ne.s32.totalorder %s2122_s12, 0 }
  0x2e   : > { %s1919_s17 = smul.u32 48, %s178_s8  ;;  %vm191_vm0 = vcmask (!%p1811_p10), 179200   ;;  %vm194_vm1 = vcmask (!%p1811_p10), 177152   ;;  %v2141_v0 = vmov (!%p1811_p10), 0.0   ;;  %v2142_v1 = vmov (!%p1811_p10), -inf  }
  0x2f   : > { %s1918_s18 = smul.u32 3, %s3347_s6  ;;  %192 = vst.msk [vmem:[#allocation2] sm:$0xff] (!%p1811_p10), %vm191_vm0, %v2141_v0  ;;  %193 = vst.msk [vmem:[#allocation2 + $0x8] sm:$0xff] (!%p1811_p10), %vm191_vm0, %v2141_v0 }
  0x30   : > { %190 = sbr.rel (%p1811_p10) target bundleno = 55 (0x37), region = 36  ;;  %195 = vst.msk [vmem:[#allocation2 + $0x10] sm:$0x3f] (!%p1811_p10), %vm194_vm1, %v2141_v0  ;;  %198 = vst.msk [vmem:[#allocation3 + $0x10] sm:$0x3f] (!%p1811_p10), %vm194_vm1, %v2142_v1 }
  0x31   : > { %s183_s21 = sadd.s32 %s1919_s17, %s1918_s18  ;;  %196 = vst.msk [vmem:[#allocation3] sm:$0xff] (!%p1811_p10), %vm191_vm0, %v2142_v1  ;;  %197 = vst.msk [vmem:[#allocation3 + $0x8] sm:$0xff] (!%p1811_p10), %vm191_vm0, %v2142_v1 }
  0x32   : > { %s1810_s24 = sshll.u32 %s183_s21, 3 }
  0x33   : > { %s2266_s27 = scalar_lea.vmem %s3326_s1, %s1810_s24 }
  0x37 PF: > { %v199_v2 = vld [vmem:[%s2266_s27] sm:$0xff]  ;;  %v202_v3 = vld [vmem:[%s2266_s27 + $0x18] sm:$0xff]  ;;  %v205_v4 = vld [vmem:[%s2266_s27 + $0x30] sm:$0xff]  ;;  %vm226_vm2 = vcmask 179200   ;;  %vm257_vm3 = vcmask 177152   ;;  %p1812_p12 = scmp.ne.s32.totalorder %s2122_s12, 1 }
  0x38   : > { %v2275_v5 = vld [vmem:[%s2266_s27 + $0x48] sm:$0xff]  ;;  %v2278_v6 = vld [vmem:[%s2266_s27 + $0x60] sm:$0xff]  ;;  %v2281_v7 = vld [vmem:[%s2266_s27 + $0x78] sm:$0xff]  ;;  %v227_v8 = vsel %vm226_vm2, %v199_v2, 0.0  ;;  %v228_v9 = vsel %vm226_vm2, %v202_v3, 0.0  ;;  %v230_v10 = vsel %vm226_vm2, %v205_v4, 0.0 }
  0x39   : > { %v2287_v11 = vld [vmem:[%s2266_s27 + $0x90] sm:$0xff]  ;;  %v2290_v12 = vld [vmem:[%s2266_s27 + $0xa8] sm:$0xff]  ;;  %v229_v13 = vadd.f32 %v228_v9, %v227_v8  ;;  %v232_v14 = vsel %vm226_vm2, %v2275_v5, 0.0  ;;  %v234_v15 = vsel %vm226_vm2, %v2278_v6, 0.0  ;;  %v236_v16 = vsel %vm226_vm2, %v2281_v7, 0.0  ;;  %v2304_v19 = vld [vmem:[%s2266_s27 + $0x20] sm:$0xff] }
  0x3a   : > { %v238_v17 = vsel %vm226_vm2, %v2287_v11, 0.0  ;;  %v2301_v18 = vld [vmem:[%s2266_s27 + $0x8] sm:$0xff]  ;;  %v2307_v20 = vld [vmem:[%s2266_s27 + $0x38] sm:$0xff]  ;;  %v2310_v22 = vld [vmem:[%s2266_s27 + $0x50] sm:$0xff]  ;;  %v243_v26 = vsel %vm226_vm2, %v2304_v19, 0.0  ;;  %v240_v28 = vsel %vm226_vm2, %v2290_v12, 0.0 }
  0x3b   : > { %v231_v21 = vadd.f32 %v230_v10, %v229_v13  ;;  %v2313_v23 = vld [vmem:[%s2266_s27 + $0x68] sm:$0xff]  ;;  %v2316_v24 = vld [vmem:[%s2266_s27 + $0x80] sm:$0xff]  ;;  %v242_v25 = vsel %vm226_vm2, %v2301_v18, 0.0  ;;  %v245_v27 = vsel %vm226_vm2, %v2307_v20, 0.0  ;;  %v2327_v29 = vld [vmem:[%s2266_s27 + $0x98] sm:$0xff]  ;;  %v247_v32 = vsel %vm226_vm2, %v2310_v22, 0.0 }
  0x3c   : > { %v2330_v30 = vld [vmem:[%s2266_s27 + $0xb0] sm:$0xff]  ;;  %v244_v31 = vadd.f32 %v243_v26, %v242_v25  ;;  %v282_v33 = vsel %vm226_vm2, %v199_v2, -inf  ;;  %v249_v35 = vsel %vm226_vm2, %v2313_v23, 0.0  ;;  %v251_v36 = vsel %vm226_vm2, %v2316_v24, 0.0  ;;  %v2343_v38 = vld [vmem:[%s2266_s27 + $0x28] sm:$0x3f] }
  0x3d   : > { %v233_v34 = vadd.f32 %v232_v14, %v231_v21  ;;  %v2340_v37 = vld [vmem:[%s2266_s27 + $0x10] sm:$0x3f]  ;;  %v2346_v40 = vld [vmem:[%s2266_s27 + $0x40] sm:$0x3f]  ;;  %v2349_v41 = vld [vmem:[%s2266_s27 + $0x58] sm:$0x3f] }
  0x3e   : > { %v246_v39 = vadd.f32 %v245_v27, %v244_v31  ;;  %v2352_v42 = vld [vmem:[%s2266_s27 + $0x70] sm:$0x3f]  ;;  %v253_v44 = vsel %vm226_vm2, %v2327_v29, 0.0  ;;  %v255_v45 = vsel %vm226_vm2, %v2330_v30, 0.0  ;;  %v2359_v46 = vld [vmem:[%s2266_s27 + $0x88] sm:$0x3f] }
  0x3f   : > { %v235_v43 = vadd.f32 %v234_v15, %v233_v34  ;;  %v2362_v47 = vld [vmem:[%s2266_s27 + $0xa0] sm:$0x3f]  ;;  %v258_v49 = vsel %vm257_vm3, %v2340_v37, 0.0  ;;  %v259_v50 = vsel %vm257_vm3, %v2343_v38, 0.0  ;;  %v261_v51 = vsel %vm257_vm3, %v2346_v40, 0.0  ;;  %v224_v26 = vld [vmem:[#allocation2 + $0x8] sm:$0xff] }
  0x40   : > { %v248_v48 = vadd.f32 %v247_v32, %v246_v39  ;;  %v2371_v53 = vld [vmem:[%s2266_s27 + $0xb8] sm:$0x3f]  ;;  %v260_v54 = vadd.f32 %v259_v50, %v258_v49  ;;  %v263_v55 = vsel %vm257_vm3, %v2349_v41, 0.0  ;;  %v265_v56 = vsel %vm257_vm3, %v2352_v42, 0.0  ;;  %v223_v1 = vld [vmem:[#allocation2] sm:$0xff]  ;;  %s1816_s29 = sld [smem:[#allocation4 + $0x2]] (!%p1812_p12) }
  0x41   : > { %v237_v52 = vadd.f32 %v236_v16, %v235_v43  ;;  %v267_v58 = vsel %vm257_vm3, %v2359_v46, 0.0  ;;  %v269_v59 = vsel %vm257_vm3, %v2362_v47, 0.0  ;;  %v271_v60 = vsel %vm257_vm3, %v2371_v53, 0.0  ;;  %s1817_s3 = sld [smem:[#allocation4 + $0x33]] (!%p1812_p12)  ;;  %s1814_s4 = sld [smem:[#allocation4 + $0x1]] (!%p1812_p12) }
  0x42   : > { %v250_v57 = vadd.f32 %v249_v35, %v248_v48  ;;  %v262_v62 = vadd.f32 %v261_v51, %v260_v54  ;;  %v283_v63 = vsel %vm226_vm2, %v202_v3, -inf  ;;  %v284_v0 = vsel %vm226_vm2, %v205_v4, -inf  ;;  %v225_v48 = vld [vmem:[#allocation2 + $0x10] sm:$0x3f]  ;;  %s1815_s6 = sld [smem:[#allocation4 + $0x32]] (!%p1812_p12)  ;;  %s2438_s7 = sld [smem:[#allocation4 + $0x3]] (!%p1812_p12) }
  0x43   : > { %v239_v61 = vadd.f32 %v238_v17, %v237_v52  ;;  %v285_v8 = vmax.f32 %v282_v33, %v284_v0  ;;  %v286_v9 = vsel %vm226_vm2, %v2275_v5, -inf  ;;  %v288_v10 = vsel %vm226_vm2, %v2278_v6, -inf  ;;  %v281_v0 = vld [vmem:[#allocation3 + $0x10] sm:$0x3f]  ;;  %s2440_s8 = sld [smem:[#allocation4 + $0x34]] (!%p1812_p12)  ;;  %s2448_s12 = sld [smem:[#allocation4 + $0x35]] (!%p1812_p12) }
  0x44   : > { %v252_v2 = vadd.f32 %v251_v36, %v250_v57  ;;  %v264_v14 = vadd.f32 %v263_v55, %v262_v62  ;;  %v287_v15 = vmax.f32 %v283_v63, %v286_v9  ;;  %v290_v16 = vsel %vm226_vm2, %v2281_v7, -inf  ;;  %v279_v36 = vld [vmem:[#allocation3] sm:$0xff]  ;;  %s2442_s17 = sld [smem:[#allocation4 + $0x4]] (!%p1812_p12)  ;;  %s2450_s18 = sld [smem:[#allocation4 + $0x5]] (!%p1812_p12) }
  0x45   : > { %v241_v13 = vadd.f32 %v240_v28, %v239_v61  ;;  %v289_v21 = vmax.f32 %v285_v8, %v288_v10  ;;  %v292_v3 = vsel %vm226_vm2, %v2287_v11, -inf  ;;  %v294_v4 = vsel %vm226_vm2, %v2290_v12, -inf  ;;  %s2452_s21 = sld [smem:[#allocation4 + $0x36]] (!%p1812_p12)  ;;  %s2460_s25 = sld [smem:[#allocation4 + $0x37]] (!%p1812_p12) }
  0x46   : > { %v254_v17 = vadd.f32 %v253_v44, %v252_v2  ;;  %v266_v5 = vadd.f32 %v265_v56, %v264_v14  ;;  %v291_v27 = vmax.f32 %v287_v15, %v290_v16  ;;  %v297_v6 = vsel %vm226_vm2, %v2301_v18, -inf  ;;  %s2458_s24 = sld [smem:[#allocation4 + $0x6]] (!%p1812_p12)  ;;  %s2468_s26 = sld [smem:[#allocation4 + $0x8]] (!%p1812_p12) }
  0x47   : > { %v273_v25 = vadd.f32 %v241_v13, %v223_v1  ;;  %v293_v31 = vmax.f32 %v289_v21, %v292_v3  ;;  %v298_v7 = vsel %vm226_vm2, %v2304_v19, -inf  ;;  %v299_v32 = vsel %vm226_vm2, %v2307_v20, -inf  ;;  %s2470_s27 = sld [smem:[#allocation4 + $0x39]] (!%p1812_p12) }
  0x48   : > { %v256_v28 = vadd.f32 %v255_v45, %v254_v17  ;;  %v268_v11 = vadd.f32 %v267_v58, %v266_v5  ;;  %v295_v33 = vmax.f32 %v291_v27, %v294_v4  ;;  %v300_v12 = vmax.f32 %v297_v6, %v299_v32 }
  0x49   : > { %276 = vst.msk [vmem:[#allocation2] sm:$0xff] %vm226_vm2, %v273_v25  ;;  %v301_v34 = vsel %vm226_vm2, %v2310_v22, -inf  ;;  %v303_v18 = vsel %vm226_vm2, %v2313_v23, -inf  ;;  %v305_v19 = vsel %vm226_vm2, %v2316_v24, -inf  ;;  %v307_v45 = vsel %vm226_vm2, %v2327_v29, -inf }
  0x4a   : > { %v274_v35 = vadd.f32 %v256_v28, %v224_v26  ;;  %v302_v39 = vmax.f32 %v298_v7, %v301_v34  ;;  %v270_v43 = vadd.f32 %v269_v59, %v268_v11  ;;  %v296_v44 = vmax.f32 %v293_v31, %v295_v33 }
  0x4b   : > { %v304_v20 = vmax.f32 %v300_v12, %v303_v18  ;;  %v309_v22 = vsel %vm226_vm2, %v2330_v30, -inf  ;;  %v312_v50 = vsel %vm257_vm3, %v2340_v37, -inf  ;;  %v313_v23 = vsel %vm257_vm3, %v2343_v38, -inf  ;;  %v280_v37 = vld [vmem:[#allocation3 + $0x8] sm:$0xff] }
  0x4c   : > { %277 = vst.msk [vmem:[#allocation2 + $0x8] sm:$0xff] %vm226_vm2, %v274_v35  ;;  %v306_v49 = vmax.f32 %v302_v39, %v305_v19  ;;  %v272_v24 = vadd.f32 %v271_v60, %v270_v43  ;;  %v327_v51 = vmax.f32 %v279_v36, %v296_v44  ;;  %v314_v54 = vsel %vm257_vm3, %v2346_v40, -inf }
  0x4d   : > { %v308_v52 = vmax.f32 %v304_v20, %v307_v45  ;;  %v315_v55 = vmax.f32 %v312_v50, %v314_v54  ;;  %v316_v56 = vsel %vm257_vm3, %v2349_v41, -inf  ;;  %v318_v30 = vsel %vm257_vm3, %v2352_v42, -inf }
  0x4e   : > { %v310_v29 = vmax.f32 %v306_v49, %v309_v22  ;;  %v275_v57 = vadd.f32 %v272_v24, %v225_v48  ;;  %330 = vst.msk [vmem:[#allocation3] sm:$0xff] %vm226_vm2, %v327_v51  ;;  %v317_v58 = vmax.f32 %v313_v23, %v316_v56  ;;  %v320_v38 = vsel %vm257_vm3, %v2359_v46, -inf }
  0x4f   : > { %v322_v59 = vsel %vm257_vm3, %v2362_v47, -inf  ;;  %v319_v60 = vmax.f32 %v315_v55, %v318_v30  ;;  %v324_v61 = vsel %vm257_vm3, %v2371_v53, -inf  ;;  %v379_v13 = vstv (!%p1812_p12), %s1816_s29  ;;  %s2143_s29 = smov (!%p1812_p12), 126  }
  0x50   : > { %v311_v40 = vmax.f32 %v308_v52, %v310_v29  ;;  %278 = vst.msk [vmem:[#allocation2 + $0x10] sm:$0x3f] %vm257_vm3, %v275_v57  ;;  %v321_v41 = vmax.f32 %v317_v58, %v320_v38  ;;  %v337_v46 = vld [vmem:[#allocation2] sm:$0xff] (!%p1812_p12)  ;;  %v383_v16 = vstv (!%p1812_p12), %s1817_s3  ;;  %v359_v3 = vstv (!%p1812_p12), %s1814_s4  ;;  %s2478_s3 = sld [smem:[#allocation4 + $0x9]] (!%p1812_p12)  ;;  %s2144_s4 = smov (!%p1812_p12), 127  }
  0x51   : > { %v323_v62 = vmax.f32 %v319_v60, %v322_v59  ;;  %v2434_v53 = vmul.f32 (!%p1812_p12), 0.0625, %v337_v46  ;;  %v363_v4 = vstv (!%p1812_p12), %s1815_s6  ;;  %v399_v28 = vstv (!%p1812_p12), %s2438_s7  ;;  %s2485_s6 = sld [smem:[#allocation4 + $0x3a]] (!%p1812_p12) }
  0x52   : > { %v328_v42 = vmax.f32 %v280_v37, %v311_v40  ;;  %v325_v63 = vmax.f32 %v321_v41, %v324_v61  ;;  %336 = sbr.rel (%p1812_p12) target bundleno = 401 (0x191), region = 40  ;;  %v403_v31 = vstv (!%p1812_p12), %s2440_s8  ;;  %v419_v35 = vstv (!%p1812_p12), %s2442_s17  ;;  %s2487_s7 = sld [smem:[#allocation4 + $0xa]] (!%p1812_p12) }
  0x53   : > { %v338_v47 = vld [vmem:[#allocation2 + $0x8] sm:$0xff] (!%p1812_p12)  ;;  %v380_v14 = vmul.f32 (!%p1812_p12), %v379_v13, %v2434_v53  ;;  %v360_v25 = vmul.f32 (!%p1812_p12), %v359_v3, %v2434_v53  ;;  %v400_v34 = vmul.f32 (!%p1812_p12), %v399_v28, %v2434_v53  ;;  %v423_v36 = vstv (!%p1812_p12), %s2448_s12  ;;  %s2504_s8 = sld [smem:[#allocation4 + $0x3b]] (!%p1812_p12)  ;;  %s2145_s17 = smov (!%p1812_p12), 125  }
  0x54   : > { %331 = vst.msk [vmem:[#allocation3 + $0x8] sm:$0xff] %vm226_vm2, %v328_v42  ;;  %v326_v1 = vmax.f32 %v323_v62, %v325_v63  ;;  %v2436_v8 = vmul.f32 (!%p1812_p12), 0.0625, %v338_v47  ;;  %v420_v44 = vmul.f32 (!%p1812_p12), %v419_v35, %v2434_v53  ;;  %v439_v45 = vstv (!%p1812_p12), %s2450_s18  ;;  %s2518_s12 = sld [smem:[#allocation4 + $0xb]] (!%p1812_p12)  ;;  %s2529_s18 = sld [smem:[#allocation4 + $0x3c]] (!%p1812_p12) }
  0x55   : > { %v2444_v9 = vld [vmem:[#allocation3] sm:$0xff] (!%p1812_p12)  ;;  %v443_v48 = vstv (!%p1812_p12), %s2452_s21  ;;  %v440_v24 = vmul.f32 (!%p1812_p12), %v439_v45, %v2434_v53  ;;  %v459_v52 = vstv (!%p1812_p12), %s2458_s24  ;;  %v463_v54 = vstv (!%p1812_p12), %s2460_s25  ;;  %s2146_s21 = smov (!%p1812_p12), 124   ;;  %s2538_s24 = sld [smem:[#allocation4 + $0xc]] (!%p1812_p12) }
  0x56   : > { %v329_v2 = vmax.f32 %v281_v0, %v326_v1  ;;  %v381_v15 = vmul.f32 (!%p1812_p12), %v379_v13, %v2436_v8  ;;  %v384_v17 = vmul.f32 (!%p1812_p12), %v383_v16, %v2444_v9  ;;  %v361_v26 = vmul.f32 (!%p1812_p12), %v359_v3, %v2436_v8  ;;  %s2540_s25 = sld [smem:[#allocation4 + $0x3d]] (!%p1812_p12) }
  0x57   : > { %v364_v5 = vmul.f32 (!%p1812_p12), %v363_v4, %v2444_v9  ;;  %v401_v11 = vmul.f32 (!%p1812_p12), %v399_v28, %v2436_v8  ;;  %v339_v39 = vld [vmem:[#allocation2 + $0x10] sm:$0x3f] (!%p1812_p12)  ;;  %v404_v18 = vmul.f32 (!%p1812_p12), %v403_v31, %v2444_v9  ;;  %v421_v19 = vmul.f32 (!%p1812_p12), %v419_v35, %v2436_v8 }
  0x58   : > { %332 = vst.msk [vmem:[#allocation3 + $0x10] sm:$0x3f] %vm257_vm3, %v329_v2  ;;  %v386_v6 = vadd.f32 (!%p1812_p12), %v384_v17, %v380_v14  ;;  %v424_v20 = vmul.f32 (!%p1812_p12), %v423_v36, %v2444_v9  ;;  %v441_v22 = vmul.f32 (!%p1812_p12), %v439_v45, %v2436_v8  ;;  %v2494_v23 = vmul.f32 (!%p1812_p12), 0.0625, %v339_v39 }
  0x59   : > { %v366_v7 = vadd.f32 %v364_v5, %v360_v25  ;;  %v444_v51 = vmul.f32 %v443_v48, %v2444_v9  ;;  %v406_v29 = vadd.f32 %v404_v18, %v400_v34  ;;  %vm494_vm4 = vcmask 1046528  }
  0x5a   : > { %390 = vrot.lane.b32.xlu1 %v386_v6, %s2143_s29  ;;  %v426_v56 = vadd.f32 %v424_v20, %v420_v44  ;;  %v461_v37 = vmul.f32 %v459_v52, %v2436_v8  ;;  %v505_v38 = vstv %s2468_s26  ;;  %v510_v59 = vstv %s2470_s27  ;;  %s2147_s26 = smov 123   ;;  %s2554_s27 = sld [smem:[#allocation4 + $0xd]] }
  0x5b   : > { %v2446_v10 = vld [vmem:[#allocation3 + $0x8] sm:$0xff]  ;;  %370 = vrot.lane.b32.xlu0 %v366_v7, %s2144_s4  ;;  %v460_v40 = vmul.f32 %v459_v52, %v2434_v53  ;;  %v507_v60 = vmul.f32 %v505_v38, %v2436_v8  ;;  %v508_v61 = vmul.f32 %v505_v38, %v2494_v23  ;;  %v446_v42 = vadd.f32 %v444_v51, %v440_v24 }
  0x5c   : > { %v385_v21 = vmul.f32 %v383_v16, %v2446_v10  ;;  %v365_v27 = vmul.f32 %v363_v4, %v2446_v10  ;;  %v405_v33 = vmul.f32 %v403_v31, %v2446_v10  ;;  %v425_v43 = vmul.f32 %v423_v36, %v2446_v10 }
  0x5d   : > { %v445_v50 = vmul.f32 %v443_v48, %v2446_v10  ;;  %v465_v58 = vmul.f32 %v463_v54, %v2446_v10  ;;  %v512_v41 = vmul.f32 %v510_v59, %v2446_v10  ;;  %v506_v63 = vmul.f32 %v505_v38, %v2434_v53 }
  0x5e   : > { %v387_v32 = vadd.f32 %v385_v21, %v381_v15  ;;  %v367_v12 = vadd.f32 %v365_v27, %v361_v26  ;;  %v407_v49 = vadd.f32 %v405_v33, %v401_v11  ;;  %v427_v55 = vadd.f32 %v425_v43, %v421_v19 }
  0x5f   : > { %v447_v30 = vadd.f32 %v445_v50, %v441_v22  ;;  %v2502_v57 = vld [vmem:[#allocation3 + $0x10] sm:$0x3f]  ;;  %v511_v0 = vmul.f32 %v510_v59, %v2444_v9  ;;  %v2521_v1 = vadd.f32 %v512_v41, %v507_v60  ;;  %v534_v2 = vstv %s2478_s3  ;;  %s2561_s3 = sld [smem:[#allocation4 + $0x3e]] }
  0x60   : > { %392 = vrot.lane.b32.xlu1 %v387_v32, %s2143_s29  ;;  %372 = vrot.lane.b32.xlu0 %v367_v12, %s2144_s4  ;;  %v513_v62 = vmul.f32 %v510_v59, %v2502_v57  ;;  %v539_v46 = vstv %s2485_s6  ;;  %v563_v47 = vstv %s2487_s7  ;;  %v464_v13 = vmul.f32 %v463_v54, %v2444_v9  ;;  %s2148_s6 = smov 122   ;;  %s2570_s7 = sld [smem:[#allocation4 + $0xf]] }
  0x61   : > { %v536_v15 = vmul.f32 %v534_v2, %v2436_v8  ;;  %v537_v16 = vmul.f32 %v534_v2, %v2494_v23  ;;  %v514_v17 = vadd.f32 %v511_v0, %v506_v63  ;;  %v541_v21 = vmul.f32 %v539_v46, %v2446_v10 }
  0x62   : > { %v516_v14 = vadd.f32 %v513_v62, %v508_v61  ;;  %v542_v3 = vmul.f32 %v539_v46, %v2502_v57  ;;  %v535_v4 = vmul.f32 %v534_v2, %v2434_v53  ;;  %v521_v25 = vrot.slane %v2521_v1, 1 }
  0x63   : > { %v540_v5 = vmul.f32 %v539_v46, %v2444_v9  ;;  %v565_v27 = vmul.f32 %v563_v47, %v2436_v8  ;;  %v544_v6 = vadd.f32 %v541_v21, %v536_v15  ;;  %v566_v31 = vmul.f32 %v563_v47, %v2494_v23 }
  0x64   : > { %412 = vrot.lane.b32.xlu1 %v407_v49, %s2145_s17  ;;  %410 = vrot.lane.b32.xlu0 %v406_v29, %s2145_s17  ;;  %v523_v26 = vrot.slane %v516_v14, 1  ;;  %v545_v28 = vadd.f32 %v542_v3, %v537_v16  ;;  %v568_v7 = vstv %s2504_s8  ;;  %v467_v32 = vadd.f32 %v465_v58, %v461_v37  ;;  %s2572_s8 = sld [smem:[#allocation4 + $0x40]] }
  0x65   : > { %v543_v11 = vadd.f32 %v540_v5, %v535_v4  ;;  %v570_v33 = vmul.f32 %v568_v7, %v2446_v10  ;;  %v466_v12 = vadd.f32 %v464_v13, %v460_v40  ;;  %v520_v34 = vrot.slane %v514_v17, 1 }
  0x66   : > { %v571_v35 = vmul.f32 %v568_v7, %v2502_v57  ;;  %v564_v36 = vmul.f32 %v563_v47, %v2434_v53  ;;  %v524_v39 = vsel %vm494_vm4, %v521_v25, %v523_v26  ;;  %v569_v19 = vmul.f32 %v568_v7, %v2444_v9 }
  0x67   : > { %v2550_v18 = vadd.f32 %v570_v33, %v565_v27  ;;  %v592_v43 = vstv %s2518_s12  ;;  %v550_v44 = vrot.slane %v544_v6, 1  ;;  %v552_v20 = vrot.slane %v545_v28, 1  ;;  %s2589_s12 = sld [smem:[#allocation4 + $0x10]] }
  0x68   : > { %432 = vrot.lane.b32.xlu1 %v427_v55, %s2146_s21  ;;  %430 = vrot.lane.b32.xlu0 %v426_v56, %s2146_s21  ;;  %v574_v45 = vadd.f32 %v571_v35, %v566_v31  ;;  %v594_v48 = vmul.f32 %v592_v43, %v2436_v8  ;;  %v549_v49 = vrot.slane %v543_v11, 1  ;;  %v595_v50 = vmul.f32 %v592_v43, %v2494_v23 }
  0x69   : > { %v579_v22 = vrot.slane %v2550_v18, 1  ;;  %v597_v24 = vstv %s2529_s18  ;;  %v572_v51 = vadd.f32 %v569_v19, %v564_v36  ;;  %v593_v29 = vmul.f32 %v592_v43, %v2434_v53  ;;  %s2596_s18 = sld [smem:[#allocation4 + $0x41]] }
  0x6a   : > { %v599_v52 = vmul.f32 %v597_v24, %v2446_v10  ;;  %v600_v54 = vmul.f32 %v597_v24, %v2502_v57  ;;  %v581_v55 = vrot.slane %v574_v45, 1  ;;  %v598_v56 = vmul.f32 %v597_v24, %v2444_v9 }
  0x6b   : > { %v626_v37 = vstv %s2540_s25  ;;  %v522_v58 = vsel %vm494_vm4, %v520_v34, %v521_v25  ;;  %v553_v38 = vsel %vm494_vm4, %v550_v44, %v552_v20  ;;  %v551_v62 = vsel %vm494_vm4, %v549_v49, %v550_v44  ;;  %s2607_s25 = sld [smem:[#allocation4 + $0x42]] }
  0x6c   : > { %452 = vrot.lane.b32.xlu1 %v447_v30, %s2147_s26  ;;  %450 = vrot.lane.b32.xlu0 %v446_v42, %s2147_s26  ;;  %v621_v30 = vstv %s2538_s24  ;;  %v602_v59 = vadd.f32 %v599_v52, %v594_v48  ;;  %v603_v60 = vadd.f32 %v600_v54, %v595_v50  ;;  %v601_v61 = vadd.f32 %v598_v56, %v593_v29  ;;  %s2605_s24 = sld [smem:[#allocation4 + $0x11]] }
  0x6d   : > { %v623_v40 = vmul.f32 %v621_v30, %v2436_v8  ;;  %v624_v41 = vmul.f32 %v621_v30, %v2494_v23  ;;  %v628_v42 = vmul.f32 %v626_v37, %v2446_v10  ;;  %v578_v63 = vrot.slane %v572_v51, 1 }
  0x6e   : > { %v629_v0 = vmul.f32 %v626_v37, %v2502_v57  ;;  %v622_v1 = vmul.f32 %v621_v30, %v2434_v53  ;;  %v582_v2 = vsel %vm494_vm4, %v579_v22, %v581_v55  ;;  %v627_v47 = vmul.f32 %v626_v37, %v2444_v9 }
  0x6f   : > { %v2585_v46 = vadd.f32 %v628_v42, %v623_v40  ;;  %v650_v13 = vstv %s2554_s27  ;;  %v608_v14 = vrot.slane %v602_v59, 1  ;;  %v610_v21 = vrot.slane %v603_v60, 1  ;;  %s2624_s27 = sld [smem:[#allocation4 + $0x12]] }
  0x70   : > { %472 = vrot.lane.b32.xlu1 %v467_v32, %s2148_s6  ;;  %470 = vrot.lane.b32.xlu0 %v466_v12, %s2148_s6  ;;  %v632_v15 = vadd.f32 %v629_v0, %v624_v41  ;;  %v652_v16 = vmul.f32 %v650_v13, %v2436_v8  ;;  %v653_v17 = vmul.f32 %v650_v13, %v2494_v23  ;;  %v607_v3 = vrot.slane %v601_v61, 1 }
  0x71   : > { %v637_v4 = vrot.slane %v2585_v46, 1  ;;  %v655_v25 = vstv %s2561_s3  ;;  %v630_v26 = vadd.f32 %v627_v47, %v622_v1  ;;  %v651_v6 = vmul.f32 %v650_v13, %v2434_v53  ;;  %s2631_s3 = sld [smem:[#allocation4 + $0x43]] }
  0x72   : > { %v657_v5 = vmul.f32 %v655_v25, %v2446_v10  ;;  %v658_v27 = vmul.f32 %v655_v25, %v2502_v57  ;;  %v639_v28 = vrot.slane %v632_v15, 1  ;;  %v656_v31 = vmul.f32 %v655_v25, %v2444_v9 }
  0x73   : > { %v705_v7 = vstv %s2570_s7  ;;  %v710_v32 = vstv %s2572_s8  ;;  %v580_v11 = vsel %vm494_vm4, %v578_v63, %v579_v22  ;;  %vm694_vm5 = vcmask 1045504   ;;  %s2640_s7 = sld [smem:[#allocation4 + $0x13]]  ;;  %s2642_s8 = sld [smem:[#allocation4 + $0x44]] }
  0x74   : > { %527 = vrot.lane.b32.xlu1 %v524_v39, %s2144_s4  ;;  %525 = vrot.lane.b32.xlu0 %v522_v58, %s2144_s4  ;;  %v660_v33 = vadd.f32 %v657_v5, %v652_v16  ;;  %v661_v12 = vadd.f32 %v658_v27, %v653_v17  ;;  %v707_v34 = vmul.f32 %v705_v7, %v2436_v8  ;;  %v636_v43 = vrot.slane %v630_v26, 1 }
  0x75   : > { %v611_v35 = vsel %vm494_vm4, %v608_v14, %v610_v21  ;;  %v659_v36 = vadd.f32 %v656_v31, %v651_v6  ;;  %v708_v39 = vmul.f32 %v705_v7, %v2494_v23  ;;  %v712_v18 = vmul.f32 %v710_v32, %v2446_v10 }
  0x76   : > { %v609_v19 = vsel %vm494_vm4, %v607_v3, %v608_v14  ;;  %v713_v44 = vmul.f32 %v710_v32, %v2502_v57  ;;  %v706_v20 = vmul.f32 %v705_v7, %v2434_v53  ;;  %v640_v45 = vsel %vm494_vm4, %v637_v4, %v639_v28 }
  0x77   : > { %v2620_v48 = vadd.f32 %v712_v18, %v707_v34  ;;  %v711_v49 = vmul.f32 %v710_v32, %v2444_v9  ;;  %v734_v22 = vstv %s2589_s12  ;;  %v666_v50 = vrot.slane %v660_v33, 1  ;;  %s2659_s12 = sld [smem:[#allocation4 + $0x14]] }
  0x78   : > { %556 = vrot.lane.b32.xlu1 %v553_v38, %s2143_s29  ;;  %554 = vrot.lane.b32.xlu0 %v551_v62, %s2143_s29  ;;  %v668_v24 = vrot.slane %v661_v12, 1  ;;  %v716_v51 = vadd.f32 %v713_v44, %v708_v39  ;;  %v736_v52 = vmul.f32 %v734_v22, %v2436_v8  ;;  %v665_v54 = vrot.slane %v659_v36, 1 }
  0x79   : > { %v721_v29 = vrot.slane %v2620_v48, 2  ;;  %v737_v55 = vmul.f32 %v734_v22, %v2494_v23  ;;  %v739_v56 = vstv %s2596_s18  ;;  %v714_v30 = vadd.f32 %v711_v49, %v706_v20  ;;  %s2666_s18 = sld [smem:[#allocation4 + $0x45]] }
  0x7a   : > { %v741_v37 = vmul.f32 %v739_v56, %v2446_v10  ;;  %v742_v58 = vmul.f32 %v739_v56, %v2502_v57  ;;  %v735_v38 = vmul.f32 %v734_v22, %v2434_v53  ;;  %v723_v59 = vrot.slane %v716_v51, 2 }
  0x7b   : > { %v740_v40 = vmul.f32 %v739_v56, %v2444_v9  ;;  %v763_v60 = vstv %s2605_s24  ;;  %v768_v61 = vstv %s2607_s25  ;;  %v638_v41 = vsel %vm494_vm4, %v636_v43, %v637_v4  ;;  %s2675_s24 = sld [smem:[#allocation4 + $0x16]]  ;;  %s2677_s25 = sld [smem:[#allocation4 + $0x47]] }
  0x7c   : > { %585 = vrot.lane.b32.xlu1 %v582_v2, %s2145_s17  ;;  %583 = vrot.lane.b32.xlu0 %v580_v11, %s2145_s17  ;;  %v669_v42 = vsel %vm494_vm4, %v666_v50, %v668_v24  ;;  %v744_v62 = vadd.f32 %v741_v37, %v736_v52  ;;  %v765_v63 = vmul.f32 %v763_v60, %v2436_v8  ;;  %v720_v13 = vrot.slane %v714_v30, 2 }
  0x7d   : > { %v745_v0 = vadd.f32 %v742_v58, %v737_v55  ;;  %v743_v1 = vadd.f32 %v740_v40, %v735_v38  ;;  %v766_v2 = vmul.f32 %v763_v60, %v2494_v23  ;;  %v770_v46 = vmul.f32 %v768_v61, %v2446_v10 }
  0x7e   : > { %v667_v47 = vsel %vm494_vm4, %v665_v54, %v666_v50  ;;  %v771_v14 = vmul.f32 %v768_v61, %v2502_v57  ;;  %v764_v15 = vmul.f32 %v763_v60, %v2434_v53  ;;  %v724_v16 = vsel %vm694_vm5, %v721_v29, %v723_v59 }
  0x7f   : > { %v2655_v17 = vadd.f32 %v770_v46, %v765_v63  ;;  %v769_v21 = vmul.f32 %v768_v61, %v2444_v9  ;;  %v792_v3 = vstv %s2624_s27  ;;  %v750_v4 = vrot.slane %v744_v62, 2  ;;  %s2694_s27 = sld [smem:[#allocation4 + $0x17]] }
  0x80   : > { %614 = vrot.lane.b32.xlu1 %v611_v35, %s2146_s21  ;;  %612 = vrot.lane.b32.xlu0 %v609_v19, %s2146_s21  ;;  %v774_v25 = vadd.f32 %v771_v14, %v766_v2  ;;  %v794_v26 = vmul.f32 %v792_v3, %v2436_v8  ;;  %v795_v5 = vmul.f32 %v792_v3, %v2494_v23  ;;  %v752_v27 = vrot.slane %v745_v0, 2 }
  0x81   : > { %v749_v6 = vrot.slane %v743_v1, 2  ;;  %v779_v28 = vrot.slane %v2655_v17, 2  ;;  %v797_v31 = vstv %s2631_s3  ;;  %v772_v7 = vadd.f32 %v769_v21, %v764_v15  ;;  %s2701_s3 = sld [smem:[#allocation4 + $0x48]] }
  0x82   : > { %v799_v32 = vmul.f32 %v797_v31, %v2446_v10  ;;  %v800_v11 = vmul.f32 %v797_v31, %v2502_v57  ;;  %v793_v33 = vmul.f32 %v792_v3, %v2434_v53  ;;  %v781_v12 = vrot.slane %v774_v25, 2 }
  0x83   : > { %v798_v34 = vmul.f32 %v797_v31, %v2444_v9  ;;  %v821_v35 = vstv %s2640_s7  ;;  %v826_v36 = vstv %s2642_s8  ;;  %v722_v39 = vsel %vm694_vm5, %v720_v13, %v721_v29  ;;  %s2710_s7 = sld [smem:[#allocation4 + $0x18]]  ;;  %s2712_s8 = sld [smem:[#allocation4 + $0x49]] }
  0x84   : > { %643 = vrot.lane.b32.xlu1 %v640_v45, %s2147_s26  ;;  %641 = vrot.lane.b32.xlu0 %v638_v41, %s2147_s26  ;;  %v802_v18 = vadd.f32 %v799_v32, %v794_v26  ;;  %v803_v19 = vadd.f32 %v800_v11, %v795_v5  ;;  %v823_v43 = vmul.f32 %v821_v35, %v2436_v8  ;;  %v778_v22 = vrot.slane %v772_v7, 2 }
  0x85   : > { %v753_v44 = vsel %vm694_vm5, %v750_v4, %v752_v27  ;;  %v801_v20 = vadd.f32 %v798_v34, %v793_v33  ;;  %v824_v45 = vmul.f32 %v821_v35, %v2494_v23  ;;  %v828_v48 = vmul.f32 %v826_v36, %v2446_v10 }
  0x86   : > { %v751_v49 = vsel %vm694_vm5, %v749_v6, %v750_v4  ;;  %v829_v50 = vmul.f32 %v826_v36, %v2502_v57  ;;  %v822_v24 = vmul.f32 %v821_v35, %v2434_v53  ;;  %v782_v51 = vsel %vm694_vm5, %v779_v28, %v781_v12 }
  0x87   : > { %v2690_v52 = vadd.f32 %v828_v48, %v823_v43  ;;  %v827_v54 = vmul.f32 %v826_v36, %v2444_v9  ;;  %v850_v29 = vstv %s2659_s12  ;;  %v808_v55 = vrot.slane %v802_v18, 2  ;;  %s2729_s12 = sld [smem:[#allocation4 + $0x19]] }
  0x88   : > { %672 = vrot.lane.b32.xlu1 %v669_v42, %s2148_s6  ;;  %670 = vrot.lane.b32.xlu0 %v667_v47, %s2148_s6  ;;  %v810_v56 = vrot.slane %v803_v19, 2  ;;  %v832_v30 = vadd.f32 %v829_v50, %v824_v45  ;;  %v852_v37 = vmul.f32 %v850_v29, %v2436_v8  ;;  %v807_v58 = vrot.slane %v801_v20, 2 }
  0x89   : > { %v837_v38 = vrot.slane %v2690_v52, 2  ;;  %v853_v59 = vmul.f32 %v850_v29, %v2494_v23  ;;  %v855_v40 = vstv %s2666_s18  ;;  %v830_v60 = vadd.f32 %v827_v54, %v822_v24  ;;  %s2736_s18 = sld [smem:[#allocation4 + $0x4a]] }
  0x8a   : > { %v857_v61 = vmul.f32 %v855_v40, %v2446_v10  ;;  %v858_v41 = vmul.f32 %v855_v40, %v2502_v57  ;;  %v851_v42 = vmul.f32 %v850_v29, %v2434_v53  ;;  %v839_v62 = vrot.slane %v832_v30, 2 }
  0x8b   : > { %v856_v63 = vmul.f32 %v855_v40, %v2444_v9  ;;  %v905_v0 = vstv %s2675_s24  ;;  %v910_v1 = vstv %s2677_s25  ;;  %v780_v2 = vsel %vm694_vm5, %v778_v22, %v779_v28  ;;  %s2745_s24 = sld [smem:[#allocation4 + $0x1a]]  ;;  %s2747_s25 = sld [smem:[#allocation4 + $0x4b]] }
  0x8c   : > { %727 = vrot.lane.b32.xlu1 %v724_v16, %s2144_s4  ;;  %725 = vrot.lane.b32.xlu0 %v722_v39, %s2144_s4  ;;  %v811_v46 = vsel %vm694_vm5, %v808_v55, %v810_v56  ;;  %v860_v47 = vadd.f32 %v857_v61, %v852_v37  ;;  %vm894_vm6 = vcmask 1044480   ;;  %v907_v13 = vmul.f32 %v905_v0, %v2436_v8 }
  0x8d   : > { %v861_v14 = vadd.f32 %v858_v41, %v853_v59  ;;  %v859_v15 = vadd.f32 %v856_v63, %v851_v42  ;;  %v908_v16 = vmul.f32 %v905_v0, %v2494_v23  ;;  %v912_v17 = vmul.f32 %v910_v1, %v2446_v10 }
  0x8e   : > { %v809_v21 = vsel %vm694_vm5, %v807_v58, %v808_v55  ;;  %v836_v3 = vrot.slane %v830_v60, 2  ;;  %v913_v4 = vmul.f32 %v910_v1, %v2502_v57  ;;  %v906_v25 = vmul.f32 %v905_v0, %v2434_v53 }
  0x8f   : > { %v840_v26 = vsel %vm694_vm5, %v837_v38, %v839_v62  ;;  %v2725_v5 = vadd.f32 %v912_v17, %v907_v13  ;;  %v911_v27 = vmul.f32 %v910_v1, %v2444_v9  ;;  %v934_v6 = vstv %s2694_s27  ;;  %s2764_s27 = sld [smem:[#allocation4 + $0x1b]] }
  0x90   : > { %756 = vrot.lane.b32.xlu1 %v753_v44, %s2143_s29  ;;  %754 = vrot.lane.b32.xlu0 %v751_v49, %s2143_s29  ;;  %v866_v28 = vrot.slane %v860_v47, 2  ;;  %v916_v31 = vadd.f32 %v913_v4, %v908_v16  ;;  %v936_v7 = vmul.f32 %v934_v6, %v2436_v8  ;;  %v937_v32 = vmul.f32 %v934_v6, %v2494_v23 }
  0x91   : > { %v868_v11 = vrot.slane %v861_v14, 2  ;;  %v865_v33 = vrot.slane %v859_v15, 2  ;;  %v921_v12 = vrot.slane %v2725_v5, 3  ;;  %v939_v34 = vstv %s2701_s3  ;;  %s2771_s3 = sld [smem:[#allocation4 + $0x4c]] }
  0x92   : > { %v914_v35 = vadd.f32 %v911_v27, %v906_v25  ;;  %v941_v36 = vmul.f32 %v939_v34, %v2446_v10  ;;  %v942_v39 = vmul.f32 %v939_v34, %v2502_v57  ;;  %v935_v18 = vmul.f32 %v934_v6, %v2434_v53 }
  0x93   : > { %v923_v19 = vrot.slane %v916_v31, 3  ;;  %v940_v43 = vmul.f32 %v939_v34, %v2444_v9  ;;  %v963_v44 = vstv %s2710_s7  ;;  %v968_v20 = vstv %s2712_s8  ;;  %s2780_s7 = sld [smem:[#allocation4 + $0x1d]]  ;;  %s2782_s8 = sld [smem:[#allocation4 + $0x4e]] }
  0x94   : > { %785 = vrot.lane.b32.xlu1 %v782_v51, %s2145_s17  ;;  %783 = vrot.lane.b32.xlu0 %v780_v2, %s2145_s17  ;;  %v838_v45 = vsel %vm694_vm5, %v836_v3, %v837_v38  ;;  %v944_v48 = vadd.f32 %v941_v36, %v936_v7  ;;  %v945_v49 = vadd.f32 %v942_v39, %v937_v32  ;;  %v920_v29 = vrot.slane %v914_v35, 3 }
  0x95   : > { %v965_v22 = vmul.f32 %v963_v44, %v2436_v8  ;;  %v869_v50 = vsel %vm694_vm5, %v866_v28, %v868_v11  ;;  %v943_v24 = vadd.f32 %v940_v43, %v935_v18  ;;  %v966_v51 = vmul.f32 %v963_v44, %v2494_v23 }
  0x96   : > { %v970_v52 = vmul.f32 %v968_v20, %v2446_v10  ;;  %v867_v54 = vsel %vm694_vm5, %v865_v33, %v866_v28  ;;  %v971_v55 = vmul.f32 %v968_v20, %v2502_v57  ;;  %v964_v56 = vmul.f32 %v963_v44, %v2434_v53 }
  0x97   : > { %v924_v30 = vsel %vm894_vm6, %v921_v12, %v923_v19  ;;  %v969_v58 = vmul.f32 %v968_v20, %v2444_v9  ;;  %v992_v38 = vstv %s2729_s12  ;;  %v950_v59 = vrot.slane %v944_v48, 3  ;;  %s2799_s12 = sld [smem:[#allocation4 + $0x1e]] }
  0x98   : > { %814 = vrot.lane.b32.xlu1 %v811_v46, %s2146_s21  ;;  %812 = vrot.lane.b32.xlu0 %v809_v21, %s2146_s21  ;;  %v2760_v37 = vadd.f32 %v970_v52, %v965_v22  ;;  %v952_v40 = vrot.slane %v945_v49, 3  ;;  %v974_v60 = vadd.f32 %v971_v55, %v966_v51  ;;  %v994_v61 = vmul.f32 %v992_v38, %v2436_v8 }
  0x99   : > { %v949_v41 = vrot.slane %v943_v24, 3  ;;  %v995_v62 = vmul.f32 %v992_v38, %v2494_v23  ;;  %v997_v63 = vstv %s2736_s18  ;;  %v972_v0 = vadd.f32 %v969_v58, %v964_v56  ;;  %s2806_s18 = sld [smem:[#allocation4 + $0x4f]] }
  0x9a   : > { %v979_v42 = vrot.slane %v2760_v37, 3  ;;  %v999_v1 = vmul.f32 %v997_v63, %v2446_v10  ;;  %v1000_v2 = vmul.f32 %v997_v63, %v2502_v57  ;;  %v993_v46 = vmul.f32 %v992_v38, %v2434_v53 }
  0x9b   : > { %v981_v47 = vrot.slane %v974_v60, 3  ;;  %v998_v13 = vmul.f32 %v997_v63, %v2444_v9  ;;  %v1021_v14 = vstv %s2745_s24  ;;  %v1026_v15 = vstv %s2747_s25  ;;  %s2815_s24 = sld [smem:[#allocation4 + $0x1f]]  ;;  %s2817_s25 = sld [smem:[#allocation4 + $0x50]] }
  0x9c   : > { %843 = vrot.lane.b32.xlu1 %v840_v26, %s2147_s26  ;;  %841 = vrot.lane.b32.xlu0 %v838_v45, %s2147_s26  ;;  %v922_v16 = vsel %vm894_vm6, %v920_v29, %v921_v12  ;;  %v953_v17 = vsel %vm894_vm6, %v950_v59, %v952_v40  ;;  %v1002_v21 = vadd.f32 %v999_v1, %v994_v61  ;;  %v978_v6 = vrot.slane %v972_v0, 3 }
  0x9d   : > { %v1023_v3 = vmul.f32 %v1021_v14, %v2436_v8  ;;  %v1003_v4 = vadd.f32 %v1000_v2, %v995_v62  ;;  %v1001_v25 = vadd.f32 %v998_v13, %v993_v46  ;;  %v1024_v26 = vmul.f32 %v1021_v14, %v2494_v23 }
  0x9e   : > { %v1028_v5 = vmul.f32 %v1026_v15, %v2446_v10  ;;  %v951_v27 = vsel %vm894_vm6, %v949_v41, %v950_v59  ;;  %v1029_v28 = vmul.f32 %v1026_v15, %v2502_v57  ;;  %v1022_v31 = vmul.f32 %v1021_v14, %v2434_v53 }
  0x9f   : > { %v982_v7 = vsel %vm894_vm6, %v979_v42, %v981_v47  ;;  %v1027_v11 = vmul.f32 %v1026_v15, %v2444_v9  ;;  %v1050_v33 = vstv %s2764_s27  ;;  %v1008_v12 = vrot.slane %v1002_v21, 3  ;;  %s2832_s27 = sld [smem:[#allocation4 + $0x20]] }
  0xa0   : > { %872 = vrot.lane.b32.xlu1 %v869_v50, %s2148_s6  ;;  %870 = vrot.lane.b32.xlu0 %v867_v54, %s2148_s6  ;;  %v2795_v32 = vadd.f32 %v1028_v5, %v1023_v3  ;;  %v1032_v34 = vadd.f32 %v1029_v28, %v1024_v26  ;;  %v1052_v35 = vmul.f32 %v1050_v33, %v2436_v8  ;;  %v1010_v39 = vrot.slane %v1003_v4, 3 }
  0xa1   : > { %v1053_v36 = vmul.f32 %v1050_v33, %v2494_v23  ;;  %v1007_v18 = vrot.slane %v1001_v25, 3  ;;  %v1055_v43 = vstv %s2771_s3  ;;  %v1030_v44 = vadd.f32 %v1027_v11, %v1022_v31  ;;  %s2838_s3 = sld [smem:[#allocation4 + $0x51]] }
  0xa2   : > { %v1037_v19 = vrot.slane %v2795_v32, 3  ;;  %v1057_v20 = vmul.f32 %v1055_v43, %v2446_v10  ;;  %v1058_v45 = vmul.f32 %v1055_v43, %v2502_v57  ;;  %v1051_v48 = vmul.f32 %v1050_v33, %v2434_v53 }
  0xa3   : > { %v1039_v49 = vrot.slane %v1032_v34, 3  ;;  %v1056_v22 = vmul.f32 %v1055_v43, %v2444_v9  ;;  %v1105_v50 = vstv %s2780_s7  ;;  %v1110_v24 = vstv %s2782_s8  ;;  %s2847_s7 = sld [smem:[#allocation4 + $0x21]]  ;;  %s2849_s8 = sld [smem:[#allocation4 + $0x52]] }
  0xa4   : > { %927 = vrot.lane.b32.xlu1 %v924_v30, %s2144_s4  ;;  %925 = vrot.lane.b32.xlu0 %v922_v16, %s2144_s4  ;;  %v980_v51 = vsel %vm894_vm6, %v978_v6, %v979_v42  ;;  %v1060_v52 = vadd.f32 %v1057_v20, %v1052_v35  ;;  %v1061_v54 = vadd.f32 %v1058_v45, %v1053_v36  ;;  %vm1094_vm7 = vcmask 1043456  }
  0xa5   : > { %v1107_v29 = vmul.f32 %v1105_v50, %v2436_v8  ;;  %v1011_v55 = vsel %vm894_vm6, %v1008_v12, %v1010_v39  ;;  %v1059_v56 = vadd.f32 %v1056_v22, %v1051_v48  ;;  %v1108_v30 = vmul.f32 %v1105_v50, %v2494_v23 }
  0xa6   : > { %v1112_v37 = vmul.f32 %v1110_v24, %v2446_v10  ;;  %v1009_v58 = vsel %vm894_vm6, %v1007_v18, %v1008_v12  ;;  %v1036_v38 = vrot.slane %v1030_v44, 3  ;;  %v1113_v59 = vmul.f32 %v1110_v24, %v2502_v57 }
  0xa7   : > { %v1106_v40 = vmul.f32 %v1105_v50, %v2434_v53  ;;  %v1040_v60 = vsel %vm894_vm6, %v1037_v19, %v1039_v49  ;;  %v1111_v41 = vmul.f32 %v1110_v24, %v2444_v9  ;;  %v1134_v42 = vstv %s2799_s12  ;;  %s2864_s12 = sld [smem:[#allocation4]] }
  0xa8   : > { %956 = vrot.lane.b32.xlu1 %v953_v17, %s2143_s29  ;;  %954 = vrot.lane.b32.xlu0 %v951_v27, %s2143_s29  ;;  %v1115_v61 = vadd.f32 %v1112_v37, %v1107_v29  ;;  %v1066_v62 = vrot.slane %v1060_v52, 3  ;;  %v1068_v63 = vrot.slane %v1061_v54, 3  ;;  %v1065_v0 = vrot.slane %v1059_v56, 3 }
  0xa9   : > { %v1116_v1 = vadd.f32 %v1113_v59, %v1108_v30  ;;  %v1114_v2 = vadd.f32 %v1111_v41, %v1106_v40  ;;  %v1136_v46 = vmul.f32 %v1134_v42, %v2436_v8  ;;  %v1137_v47 = vmul.f32 %v1134_v42, %v2494_v23 }
  0xaa   : > { %v1139_v13 = vstv %s2806_s18  ;;  %v1121_v14 = vrot.slane %v1115_v61, 4  ;;  %v1135_v17 = vmul.f32 %v1134_v42, %v2434_v53  ;;  %v1163_v4 = vstv %s2815_s24  ;;  %s2871_s18 = sld [smem:[#allocation4 + $0x31]]  ;;  %s2876_s24 = sld [smem:[#allocation4 + $0x22]] }
  0xab   : > { %v1141_v15 = vmul.f32 %v1139_v13, %v2446_v10  ;;  %v1142_v16 = vmul.f32 %v1139_v13, %v2502_v57  ;;  %v1123_v21 = vrot.slane %v1116_v1, 4  ;;  %v1140_v3 = vmul.f32 %v1139_v13, %v2444_v9  ;;  %v2897_v1 = vld [vmem:[#allocation3] sm:$0xff] }
  0xac   : > { %985 = vrot.lane.b32.xlu1 %v982_v7, %s2145_s17  ;;  %983 = vrot.lane.b32.xlu0 %v980_v51, %s2145_s17  ;;  %v1168_v25 = vstv %s2817_s25  ;;  %v1038_v26 = vsel %vm894_vm6, %v1036_v38, %v1037_v19  ;;  %v1069_v5 = vsel %vm894_vm6, %v1066_v62, %v1068_v63  ;;  %v1120_v27 = vrot.slane %v1114_v2, 4  ;;  %s2878_s25 = sld [smem:[#allocation4 + $0x53]] }
  0xad   : > { %v1165_v6 = vmul.f32 %v1163_v4, %v2436_v8  ;;  %v1144_v28 = vadd.f32 %v1141_v15, %v1136_v46  ;;  %v1145_v31 = vadd.f32 %v1142_v16, %v1137_v47  ;;  %v1166_v7 = vmul.f32 %v1163_v4, %v2494_v23 }
  0xae   : > { %v1170_v32 = vmul.f32 %v1168_v25, %v2446_v10  ;;  %v1067_v11 = vsel %vm894_vm6, %v1065_v0, %v1066_v62  ;;  %v1143_v33 = vadd.f32 %v1140_v3, %v1135_v17  ;;  %v1171_v12 = vmul.f32 %v1168_v25, %v2502_v57 }
  0xaf   : > { %v1164_v34 = vmul.f32 %v1163_v4, %v2434_v53  ;;  %v1124_v35 = vsel %vm1094_vm7, %v1121_v14, %v1123_v21  ;;  %v1169_v39 = vmul.f32 %v1168_v25, %v2444_v9  ;;  %v1192_v18 = vstv %s2832_s27  ;;  %s2890_s27 = sld [smem:[#allocation4 + $0x24]] }
  0xb0   : > { %1014 = vrot.lane.b32.xlu1 %v1011_v55, %s2146_s21  ;;  %1012 = vrot.lane.b32.xlu0 %v1009_v58, %s2146_s21  ;;  %v1173_v36 = vadd.f32 %v1170_v32, %v1165_v6  ;;  %v1122_v19 = vsel %vm1094_vm7, %v1120_v27, %v1121_v14  ;;  %v1174_v43 = vadd.f32 %v1171_v12, %v1166_v7  ;;  %v1150_v45 = vrot.slane %v1144_v28, 4 }
  0xb1   : > { %v1194_v44 = vmul.f32 %v1192_v18, %v2436_v8  ;;  %v1195_v20 = vmul.f32 %v1192_v18, %v2494_v23  ;;  %v1152_v48 = vrot.slane %v1145_v31, 4  ;;  %v1172_v49 = vadd.f32 %v1169_v39, %v1164_v34 }
  0xb2   : > { %v1197_v22 = vstv %s2838_s3  ;;  %v1149_v50 = vrot.slane %v1143_v33, 4  ;;  %v1193_v52 = vmul.f32 %v1192_v18, %v2434_v53  ;;  %v1179_v54 = vrot.slane %v1173_v36, 4  ;;  %s2901_s3 = sld [smem:[#allocation4 + $0x55]] }
  0xb3   : > { %v1199_v24 = vmul.f32 %v1197_v22, %v2446_v10  ;;  %v1200_v51 = vmul.f32 %v1197_v22, %v2502_v57  ;;  %v1198_v29 = vmul.f32 %v1197_v22, %v2444_v9  ;;  %v1221_v55 = vstv %s2847_s7  ;;  %s2910_s7 = sld [smem:[#allocation4 + $0x25]] }
  0xb4   : > { %1043 = vrot.lane.b32.xlu1 %v1040_v60, %s2147_s26  ;;  %1041 = vrot.lane.b32.xlu0 %v1038_v26, %s2147_s26  ;;  %v1226_v56 = vstv %s2849_s8  ;;  %v1181_v30 = vrot.slane %v1174_v43, 4  ;;  %v1223_v58 = vmul.f32 %v1221_v55, %v2436_v8  ;;  %v1178_v38 = vrot.slane %v1172_v49, 4  ;;  %v2887_v60 = vld [vmem:[#allocation3 + $0x8] sm:$0xff]  ;;  %s2912_s8 = sld [smem:[#allocation4 + $0x56]] }
  0xb5   : > { %v1202_v37 = vadd.f32 %v1199_v24, %v1194_v44  ;;  %v1203_v10 = vadd.f32 %v1200_v51, %v1195_v20  ;;  %v1201_v59 = vadd.f32 %v1198_v29, %v1193_v52  ;;  %v1224_v40 = vmul.f32 %v1221_v55, %v2494_v23 }
  0xb6   : > { %v1228_v61 = vmul.f32 %v2887_v60, %v1226_v56  ;;  %v1229_v42 = vmul.f32 %v1226_v56, %v2502_v57  ;;  %v1222_v62 = vmul.f32 %v1221_v55, %v2434_v53  ;;  %v1227_v2 = vmul.f32 %v2897_v1, %v1226_v56 }
  0xb7   : > { %v1208_v9 = vrot.slane %v1202_v37, 4  ;;  %v1210_v41 = vrot.slane %v1203_v10, 4  ;;  %v1207_v63 = vrot.slane %v1201_v59, 4  ;;  %v347_v46 = vstv %s2864_s12  ;;  %s2930_s12 = sld [smem:[#allocation4 + $0x26]] }
  0xb8   : > { %1072 = vrot.lane.b32.xlu1 %v1069_v5, %s2148_s6  ;;  %1070 = vrot.lane.b32.xlu0 %v1067_v11, %s2148_s6  ;;  %v2895_v0 = vadd.f32 %v1228_v61, %v1223_v58  ;;  %v1153_v47 = vsel %vm1094_vm7, %v1150_v45, %v1152_v48  ;;  %v1151_v13 = vsel %vm1094_vm7, %v1149_v50, %v1150_v45  ;;  %v351_v21 = vstv %s2871_s18  ;;  %s2937_s18 = sld [smem:[#allocation4 + $0x57]]  ;;  %v2957_v61 = vld [vmem:[#allocation3 + $0x10] sm:$0x3f] }
  0xb9   : > { %v1182_v14 = vsel %vm1094_vm7, %v1179_v54, %v1181_v30  ;;  %v1180_v15 = vsel %vm1094_vm7, %v1178_v38, %v1179_v54  ;;  %v1211_v16 = vsel %vm1094_vm7, %v1208_v9, %v1210_v41  ;;  %v1232_v17 = vadd.f32 %v1229_v42, %v1224_v40 }
  0xba   : > { %v1209_v3 = vsel %vm1094_vm7, %v1207_v63, %v1208_v9  ;;  %v348_v4 = vmul.f32 %v347_v46, %v2434_v53  ;;  %v1250_v25 = vstv %s2876_s24  ;;  %v1255_v26 = vstv %s2878_s25  ;;  %s2946_s24 = sld [smem:[#allocation4 + $0x27]]  ;;  %s2948_s25 = sld [smem:[#allocation4 + $0x58]] }
  0xbb   : > { %v1237_v5 = vrot.slane %v2895_v0, 4  ;;  %v1230_v27 = vadd.f32 %v1227_v2, %v1222_v62  ;;  %v1252_v6 = vmul.f32 %v1250_v25, %v2436_v8  ;;  %v1253_v28 = vmul.f32 %v1250_v25, %v2494_v23 }
  0xbc   : > { %1127 = vrot.lane.b32.xlu1 %v1124_v35, %s2144_s4  ;;  %1125 = vrot.lane.b32.xlu0 %v1122_v19, %s2144_s4  ;;  %v352_v31 = vmul.f32 %v2897_v1, %v351_v21  ;;  %v1257_v7 = vmul.f32 %v2887_v60, %v1255_v26  ;;  %v1258_v32 = vmul.f32 %v1255_v26, %v2502_v57  ;;  %v1239_v33 = vrot.slane %v1232_v17, 4 }
  0xbd   : > { %v1251_v11 = vmul.f32 %v1250_v25, %v2434_v53  ;;  %v1256_v12 = vmul.f32 %v2897_v1, %v1255_v26  ;;  %v349_v34 = vmul.f32 %v347_v46, %v2436_v8  ;;  %v1305_v35 = vstv %s2890_s27  ;;  %s2978_s27 = sld [smem:[#allocation4 + $0x28]] }
  0xbe   : > { %v1260_v36 = vadd.f32 %v1257_v7, %v1252_v6  ;;  %v1261_v39 = vadd.f32 %v1258_v32, %v1253_v28  ;;  %v1307_v18 = vmul.f32 %v1305_v35, %v2436_v8  ;;  %v1308_v19 = vmul.f32 %v1305_v35, %v2494_v23 }
  0xbf   : > { %v1236_v43 = vrot.slane %v1230_v27, 4  ;;  %v1259_v44 = vadd.f32 %v1256_v12, %v1251_v11  ;;  %vm1294_vm8 = vcmask 1042432   ;;  %v1310_v20 = vstv %s2901_s3  ;;  %s2988_s3 = sld [smem:[#allocation4 + $0x59]] }
  0xc0   : > { %1156 = vrot.lane.b32.xlu1 %v1153_v47, %s2143_s29  ;;  %1154 = vrot.lane.b32.xlu0 %v1151_v13, %s2143_s29  ;;  %v1306_v45 = vmul.f32 %v1305_v35, %v2434_v53  ;;  %v354_v48 = vadd.f32 %v352_v31, %v348_v4  ;;  %v353_v49 = vmul.f32 %v2887_v60, %v351_v21  ;;  %v1266_v24 = vrot.slane %v1260_v36, 4 }
  0xc1   : > { %v1312_v22 = vmul.f32 %v2887_v60, %v1310_v20  ;;  %v1313_v50 = vmul.f32 %v1310_v20, %v2502_v57  ;;  %v1311_v51 = vmul.f32 %v2897_v1, %v1310_v20  ;;  %v1334_v52 = vstv %s2910_s7  ;;  %s2990_s7 = sld [smem:[#allocation4 + $0x29]] }
  0xc2   : > { %v1339_v54 = vstv %s2912_s8  ;;  %v1268_v29 = vrot.slane %v1261_v39, 4  ;;  %v1336_v30 = vmul.f32 %v1334_v52, %v2436_v8  ;;  %v1265_v37 = vrot.slane %v1259_v44, 4  ;;  %s2996_s8 = sld [smem:[#allocation4 + $0x5a]] }
  0xc3   : > { %v1315_v55 = vadd.f32 %v1312_v22, %v1307_v18  ;;  %v1316_v56 = vadd.f32 %v1313_v50, %v1308_v19  ;;  %v1314_v10 = vadd.f32 %v1311_v51, %v1306_v45  ;;  %v1337_v57 = vmul.f32 %v1334_v52, %v2494_v23 }
  0xc4   : > { %1185 = vrot.lane.b32.xlu1 %v1182_v14, %s2145_s17  ;;  %1183 = vrot.lane.b32.xlu0 %v1180_v15, %s2145_s17  ;;  %v1341_v58 = vmul.f32 %v2887_v60, %v1339_v54  ;;  %v1240_v38 = vsel %vm1094_vm7, %v1237_v5, %v1239_v33  ;;  %v1238_v59 = vsel %vm1094_vm7, %v1236_v43, %v1237_v5  ;;  %v1363_v63 = vstv %s2930_s12  ;;  %s3004_s12 = sld [smem:[#allocation4 + $0x2b]] }
  0xc5   : > { %v355_v40 = vadd.f32 %v353_v49, %v349_v34  ;;  %v1342_v9 = vmul.f32 %v2957_v61, %v1339_v54  ;;  %v1321_v41 = vrot.slane %v1315_v55, 5  ;;  %v1335_v42 = vmul.f32 %v1334_v52, %v2434_v53 }
  0xc6   : > { %v1340_v62 = vmul.f32 %v2897_v1, %v1339_v54  ;;  %v1323_v0 = vrot.slane %v1316_v56, 5  ;;  %v1320_v2 = vrot.slane %v1314_v10, 5  ;;  %v1344_v46 = vadd.f32 %v1341_v58, %v1336_v30 }
  0xc7   : > { %v1345_v47 = vadd.f32 %v1342_v9, %v1337_v57  ;;  %v1269_v13 = vsel %vm1094_vm7, %v1266_v24, %v1268_v29  ;;  %v1267_v14 = vsel %vm1094_vm7, %v1265_v37, %v1266_v24  ;;  %v1365_v15 = vmul.f32 %v1363_v63, %v2436_v8 }
  0xc8   : > { %1214 = vrot.lane.b32.xlu1 %v1211_v16, %s2146_s21  ;;  %1212 = vrot.lane.b32.xlu0 %v1209_v3, %s2146_s21  ;;  %v1368_v16 = vstv %s2937_s18  ;;  %v1366_v17 = vmul.f32 %v1363_v63, %v2494_v23  ;;  %v1364_v4 = vmul.f32 %v1363_v63, %v2434_v53  ;;  %v1343_v26 = vadd.f32 %v1340_v62, %v1335_v42  ;;  %s3019_s18 = sld [smem:[#allocation4 + $0x5c]] }
  0xc9   : > { %v1370_v21 = vmul.f32 %v2887_v60, %v1368_v16  ;;  %v1371_v3 = vmul.f32 %v2957_v61, %v1368_v16  ;;  %v1369_v5 = vmul.f32 %v2897_v1, %v1368_v16  ;;  %v1392_v27 = vstv %s2946_s24  ;;  %s3029_s24 = sld [smem:[#allocation4 + $0x2c]] }
  0xca   : > { %v1397_v6 = vstv %s2948_s25  ;;  %v1324_v31 = vsel %vm1294_vm8, %v1321_v41, %v1323_v0  ;;  %v1322_v7 = vsel %vm1294_vm8, %v1320_v2, %v1321_v41  ;;  %v1350_v32 = vrot.slane %v1344_v46, 5  ;;  %s3033_s25 = sld [smem:[#allocation4 + $0x7]] }
  0xcb   : > { %v1352_v11 = vrot.slane %v1345_v47, 5  ;;  %v1373_v12 = vadd.f32 %v1370_v21, %v1365_v15  ;;  %v1394_v34 = vmul.f32 %v1392_v27, %v2436_v8  ;;  %v1395_v35 = vmul.f32 %v1392_v27, %v2494_v23 }
  0xcc   : > { %1243 = vrot.lane.b32.xlu1 %v1240_v38, %s2147_s26  ;;  %1241 = vrot.lane.b32.xlu0 %v1238_v59, %s2147_s26  ;;  %v391_v25 = vpop.permute.xlu1 %390  ;;  %v1374_v36 = vadd.f32 %v1371_v3, %v1366_v17  ;;  %v1372_v39 = vadd.f32 %v1369_v5, %v1364_v4  ;;  %v1399_v18 = vmul.f32 %v2887_v60, %v1397_v6  ;;  %v1349_v20 = vrot.slane %v1343_v26, 5 }
  0xcd   : > { %v371_v28 = vpop.permute.xlu0 %370  ;;  %v1400_v19 = vmul.f32 %v2957_v61, %v1397_v6  ;;  %v1393_v45 = vmul.f32 %v1392_v27, %v2434_v53  ;;  %v1353_v50 = vsel %vm1294_vm8, %v1350_v32, %v1352_v11  ;;  %v1379_v52 = vrot.slane %v1373_v12, 5 }
  0xce   : > { %v376_v33 = vadd.f32 %v371_v28, %v354_v48  ;;  %v1398_v48 = vmul.f32 %v2897_v1, %v1397_v6  ;;  %v1402_v24 = vadd.f32 %v1399_v18, %v1394_v34  ;;  %v1381_v54 = vrot.slane %v1374_v36, 5 }
  0xcf   : > { %v1403_v51 = vadd.f32 %v1400_v19, %v1395_v35  ;;  %v1378_v29 = vrot.slane %v1372_v39, 5  ;;  %v1351_v37 = vsel %vm1294_vm8, %v1349_v20, %v1350_v32  ;;  %v1421_v57 = vstv %s2978_s27  ;;  %s3039_s27 = sld [smem:[#allocation4 + $0x5d]] }
  0xd0   : > { %1272 = vrot.lane.b32.xlu1 %v1269_v13, %s2148_s6  ;;  %1270 = vrot.lane.b32.xlu0 %v1267_v14, %s2148_s6  ;;  %v396_v43 = vadd.f32 %v391_v25, %v376_v33  ;;  %v1401_v55 = vadd.f32 %v1398_v48, %v1393_v45  ;;  %v1408_v59 = vrot.slane %v1402_v24, 5  ;;  %v1382_v9 = vsel %vm1294_vm8, %v1379_v52, %v1381_v54 }
  0xd1   : > { %v1380_v41 = vsel %vm1294_vm8, %v1378_v29, %v1379_v52  ;;  %v1423_v62 = vmul.f32 %v1421_v57, %v2436_v8  ;;  %v1424_v0 = vmul.f32 %v1421_v57, %v2494_v23  ;;  %v1426_v2 = vstv %s2988_s3  ;;  %s3047_s3 = sld [smem:[#allocation4 + $0x2d]] }
  0xd2   : > { %v393_v44 = vpop.permute.xlu1 %392  ;;  %v373_v49 = vpop.permute.xlu0 %372  ;;  %v1407_v42 = vrot.slane %v1401_v55, 5  ;;  %v1422_v46 = vmul.f32 %v1421_v57, %v2434_v53  ;;  %v1450_v47 = vstv %s2990_s7  ;;  %v1428_v15 = vmul.f32 %v2887_v60, %v1426_v2  ;;  %s3053_s7 = sld [smem:[#allocation4 + $0x38]] }
  0xd3   : > { %v377_v22 = vadd.f32 %v373_v49, %v355_v40  ;;  %v1410_v40 = vrot.slane %v1403_v51, 5  ;;  %v1429_v21 = vmul.f32 %v2957_v61, %v1426_v2  ;;  %v1427_v3 = vmul.f32 %v2897_v1, %v1426_v2 }
  0xd4   : > { %1327 = vrot.lane.b32.xlu1 %v1324_v31, %s2144_s4  ;;  %1325 = vrot.lane.b32.xlu0 %v1322_v7, %s2144_s4  ;;  %v1409_v4 = vsel %vm1294_vm8, %v1407_v42, %v1408_v59  ;;  %v1431_v25 = vadd.f32 %v1428_v15, %v1423_v62  ;;  %v1452_v26 = vmul.f32 %v1450_v47, %v2436_v8  ;;  %v1455_v31 = vstv %s2996_s8  ;;  %s3062_s8 = sld [smem:[#allocation4 + $0x5e]] }
  0xd5   : > { %v397_v56 = vadd.f32 %v393_v44, %v377_v22  ;;  %v1411_v17 = vsel %vm1294_vm8, %v1408_v59, %v1410_v40  ;;  %v1453_v5 = vmul.f32 %v1450_v47, %v2494_v23  ;;  %v1432_v6 = vadd.f32 %v1429_v21, %v1424_v0 }
  0xd6   : > { %v413_v30 = vpop.permute.xlu1 %412  ;;  %v411_v10 = vpop.permute.xlu0 %410  ;;  %v1430_v28 = vadd.f32 %v1427_v3, %v1422_v46  ;;  %v1451_v7 = vmul.f32 %v1450_v47, %v2434_v53  ;;  %v1437_v11 = vrot.slane %v1431_v25, 5  ;;  %v1457_v33 = vmul.f32 %v2887_v60, %v1455_v31 }
  0xd7   : > { %v417_v58 = vadd.f32 %v413_v30, %v397_v56  ;;  %v416_v38 = vadd.f32 %v411_v10, %v396_v43  ;;  %v1458_v12 = vmul.f32 %v2957_v61, %v1455_v31  ;;  %v1439_v34 = vrot.slane %v1432_v6, 5 }
  0xd8   : > { %1356 = vrot.lane.b32.xlu1 %v1353_v50, %s2143_s29  ;;  %1354 = vrot.lane.b32.xlu0 %v1351_v37, %s2143_s29  ;;  %v1436_v35 = vrot.slane %v1430_v28, 5  ;;  %v1456_v36 = vmul.f32 %v2897_v1, %v1455_v31  ;;  %v1460_v39 = vadd.f32 %v1457_v33, %v1452_v26  ;;  %v1505_v19 = vstv %s3004_s12  ;;  %s3075_s12 = sld [smem:[#allocation4 + $0x2e]] }
  0xd9   : > { %v1461_v18 = vadd.f32 %v1458_v12, %v1453_v5  ;;  %v1440_v44 = vsel %vm1294_vm8, %v1437_v11, %v1439_v34  ;;  %v1507_v50 = vmul.f32 %v1505_v19, %v2436_v8  ;;  %v1508_v24 = vmul.f32 %v1505_v19, %v2494_v23 }
  0xda   : > { %v433_v63 = vpop.permute.xlu1 %432  ;;  %v431_v14 = vpop.permute.xlu0 %430  ;;  %v1438_v20 = vsel %vm1294_vm8, %v1436_v35, %v1437_v11  ;;  %v1459_v45 = vadd.f32 %v1456_v36, %v1451_v7  ;;  %v1466_v49 = vrot.slane %v1460_v39, 5  ;;  %v1510_v52 = vstv %s3019_s18  ;;  %s3083_s18 = sld [smem:[#allocation4 + $0x5f]] }
  0xdb   : > { %v3010_v13 = vadd.f32 %v433_v63, %v417_v58  ;;  %v3013_v16 = vadd.f32 %v431_v14, %v416_v38  ;;  %v1468_v22 = vrot.slane %v1461_v18, 5  ;;  %v1506_v54 = vmul.f32 %v1505_v19, %v2434_v53 }
  0xdc   : > { %1385 = vrot.lane.b32.xlu1 %v1382_v9, %s2145_s17  ;;  %1383 = vrot.lane.b32.xlu0 %v1380_v41, %s2145_s17  ;;  %v1465_v51 = vrot.slane %v1459_v45, 5  ;;  %v1512_v55 = vmul.f32 %v2887_v60, %v1510_v52  ;;  %v1513_v56 = vmul.f32 %v2957_v61, %v1510_v52  ;;  %v1511_v10 = vmul.f32 %v2897_v1, %v1510_v52 }
  0xdd   : > { %v1469_v29 = vsel %vm1294_vm8, %v1466_v49, %v1468_v22  ;;  %v1534_v57 = vstv %s3029_s24  ;;  %v3070_v58 = vstv %s3033_s25  ;;  %vm1494_vm9 = vcmask 1041408   ;;  %s3104_s24 = sld [smem:[#allocation4 + $0x2f]]  ;;  %s3106_s25 = sld [smem:[#allocation4 + $0x60]] }
  0xde   : > { %v3025_v27 = vpop.permute.xlu1 %452  ;;  %v3031_v32 = vpop.permute.xlu0 %450  ;;  %v1467_v37 = vsel %vm1294_vm8, %v1465_v51, %v1466_v49  ;;  %v1515_v59 = vadd.f32 %v1512_v55, %v1507_v50  ;;  %v1516_v40 = vadd.f32 %v1513_v56, %v1508_v24  ;;  %v1536_v9 = vmul.f32 %v1534_v57, %v2436_v8 }
  0xdf   : > { %v1514_v41 = vadd.f32 %v1511_v10, %v1506_v54  ;;  %v1537_v42 = vmul.f32 %v1534_v57, %v2494_v23  ;;  %v1539_v62 = vstv %s3039_s27  ;;  %v1535_v15 = vmul.f32 %v1534_v57, %v2434_v53  ;;  %s3171_s27 = sld [smem:[#allocation4 + $0x3f]] }
  0xe0   : > { %1414 = vrot.lane.b32.xlu1 %v1411_v17, %s2146_s21  ;;  %1412 = vrot.lane.b32.xlu0 %v1409_v4, %s2146_s21  ;;  %v1521_v63 = vrot.slane %v1515_v59, 6  ;;  %v1523_v0 = vrot.slane %v1516_v40, 6  ;;  %v1541_v2 = vmul.f32 %v2887_v60, %v1539_v62  ;;  %v1542_v46 = vmul.f32 %v2957_v61, %v1539_v62 }
  0xe1   : > { %v1520_v14 = vrot.slane %v1514_v41, 6  ;;  %v1540_v17 = vmul.f32 %v2897_v1, %v1539_v62  ;;  %v1563_v21 = vstv %s3047_s3  ;;  %v3092_v3 = vmul.f32 %v3070_v58, %v2436_v8  ;;  %s1869_s3 = sld [smem:[#allocation4 + $0x4d]] }
  0xe2   : > { %v3043_v43 = vpop.permute.xlu1 %472  ;;  %v3049_v48 = vpop.permute.xlu0 %470  ;;  %v1524_v25 = vsel %vm1494_vm9, %v1521_v63, %v1523_v0  ;;  %v1544_v26 = vadd.f32 %v1541_v2, %v1536_v9  ;;  %v1545_v5 = vadd.f32 %v1542_v46, %v1537_v42  ;;  %v484_v6 = vstv %s3053_s7  ;;  %s1882_s7 = sld [smem:[#allocation4 + $0x23]] }
  0xe3   : > { %v1522_v28 = vsel %vm1494_vm9, %v1520_v14, %v1521_v63  ;;  %v1543_v31 = vadd.f32 %v1540_v17, %v1535_v15  ;;  %v1565_v7 = vmul.f32 %v1563_v21, %v2436_v8  ;;  %v1566_v12 = vmul.f32 %v1563_v21, %v2494_v23 }
  0xe4   : > { %1443 = vrot.lane.b32.xlu1 %v1440_v44, %s2147_s26  ;;  %1441 = vrot.lane.b32.xlu0 %v1438_v20, %s2147_s26  ;;  %v1550_v11 = vrot.slane %v1544_v26, 6  ;;  %v1552_v33 = vrot.slane %v1545_v5, 6  ;;  %v1568_v34 = vstv %s3062_s8  ;;  %v1564_v19 = vmul.f32 %v1563_v21, %v2434_v53  ;;  %s1883_s8 = sld [smem:[#allocation4 + $0x54]] }
  0xe5   : > { %v1549_v36 = vrot.slane %v1543_v31, 6  ;;  %v1570_v39 = vmul.f32 %v2887_v60, %v1568_v34  ;;  %v1571_v18 = vmul.f32 %v2957_v61, %v1568_v34  ;;  %v482_v44 = vmul.f32 %v3070_v58, %v2494_v23 }
  0xe6   : > { %v3064_v30 = vpop.permute.xlu1 %527  ;;  %v3072_v38 = vpop.permute.xlu0 %525  ;;  %v1553_v45 = vsel %vm1494_vm9, %v1550_v11, %v1552_v33  ;;  %v1569_v49 = vmul.f32 %v2897_v1, %v1568_v34  ;;  %v1592_v22 = vstv %s3075_s12  ;;  %v486_v50 = vmul.f32 %v2887_v60, %v484_v6  ;;  %s1896_s12 = sld [smem:[#allocation4 + $0x2a]] }
  0xe7   : > { %v1551_v24 = vsel %vm1494_vm9, %v1549_v36, %v1550_v11  ;;  %v1573_v51 = vadd.f32 %v1570_v39, %v1565_v7  ;;  %v1574_v52 = vadd.f32 %v1571_v18, %v1566_v12  ;;  %v1595_v55 = vmul.f32 %v1592_v22, %v2494_v23 }
  0xe8   : > { %1472 = vrot.lane.b32.xlu1 %v1469_v29, %s2148_s6  ;;  %1470 = vrot.lane.b32.xlu0 %v1467_v37, %s2148_s6  ;;  %v1572_v54 = vadd.f32 %v1569_v49, %v1564_v19  ;;  %v1594_v29 = vmul.f32 %v1592_v22, %v2436_v8  ;;  %v1597_v56 = vstv %s3083_s18  ;;  %v487_v9 = vmul.f32 %v2957_v61, %v484_v6  ;;  %s1897_s18 = sld [smem:[#allocation4 + $0x5b]] }
  0xe9   : > { %v1579_v10 = vrot.slane %v1573_v51, 6  ;;  %v1581_v57 = vrot.slane %v1574_v52, 6  ;;  %v1599_v59 = vmul.f32 %v2887_v60, %v1597_v56  ;;  %v1600_v40 = vmul.f32 %v2957_v61, %v1597_v56 }
  0xea   : > { %v3085_v47 = vpop.permute.xlu1 %556  ;;  %v3094_v4 = vpop.permute.xlu0 %554  ;;  %v1578_v42 = vrot.slane %v1572_v54, 6  ;;  %v1593_v62 = vmul.f32 %v1592_v22, %v2434_v53  ;;  %v1598_v63 = vmul.f32 %v2897_v1, %v1597_v56  ;;  %v480_v0 = vmul.f32 %v3070_v58, %v2434_v53 }
  0xeb   : > { %v1582_v2 = vsel %vm1494_vm9, %v1579_v10, %v1581_v57  ;;  %v1602_v46 = vadd.f32 %v1599_v59, %v1594_v29  ;;  %v1603_v14 = vadd.f32 %v1600_v40, %v1595_v55  ;;  %v1621_v21 = vstv %s3104_s24 }
  0xec   : > { %1527 = vrot.lane.b32.xlu1 %v1524_v25, %s2144_s4  ;;  %1525 = vrot.lane.b32.xlu0 %v1522_v28, %s2144_s4  ;;  %v1580_v15 = vsel %vm1494_vm9, %v1578_v42, %v1579_v10  ;;  %v1601_v17 = vadd.f32 %v1598_v63, %v1593_v62  ;;  %v1626_v25 = vstv %s3106_s25  ;;  %v1623_v58 = vmul.f32 %v1621_v21, %v2436_v8  ;;  %s3155_s4 = sld [smem:[#allocation4 + $0x61]] }
  0xed   : > { %v1608_v5 = vrot.slane %v1602_v46, 6  ;;  %v1610_v28 = vrot.slane %v1603_v14, 6  ;;  %v1624_v31 = vmul.f32 %v1621_v21, %v2494_v23  ;;  %v485_v7 = vmul.f32 %v2897_v1, %v484_v6 }
  0xee   : > { %v3108_v35 = vpop.permute.xlu1 %585  ;;  %v3115_v20 = vpop.permute.xlu0 %583  ;;  %v1607_v33 = vrot.slane %v1601_v17, 6  ;;  %v1628_v12 = vmul.f32 %v2887_v60, %v1626_v25  ;;  %v1629_v34 = vmul.f32 %v2957_v61, %v1626_v25  ;;  %v489_v36 = vadd.f32 %v486_v50, %v3092_v3 }
  0xef   : > { %v1611_v39 = vsel %vm1494_vm9, %v1608_v5, %v1610_v28  ;;  %v1622_v18 = vmul.f32 %v1621_v21, %v2434_v53  ;;  %v1627_v19 = vmul.f32 %v2897_v1, %v1626_v25  ;;  %v488_v3 = vadd.f32 %v485_v7, %v480_v0 }
  0xf0   : > { %1556 = vrot.lane.b32.xlu1 %v1553_v45, %s2143_s29  ;;  %1554 = vrot.lane.b32.xlu0 %v1551_v24, %s2143_s29  ;;  %s3143_s29 = sld [smem:[#allocation4 + $0x30]]  ;;  %v490_v45 = vadd.f32 %v487_v9, %v482_v44  ;;  %v1609_v6 = vsel %vm1494_vm9, %v1607_v33, %v1608_v5  ;;  %v1631_v49 = vadd.f32 %v1628_v12, %v1623_v58  ;;  %v496_v44 = vrot.slane %v489_v36, 1 }
  0xf1   : > { %v1632_v22 = vadd.f32 %v1629_v34, %v1624_v31  ;;  %v1630_v51 = vadd.f32 %v1627_v19, %v1622_v18  ;;  %v457_v42 = vadd.f32 %v3025_v27, %v3010_v13  ;;  %v495_v62 = vrot.slane %v488_v3, 1 }
  0xf2   : > { %v3127_v37 = vpop.permute.xlu1 %614  ;;  %v3132_v41 = vpop.permute.xlu0 %612  ;;  %v1637_v52 = vrot.slane %v1631_v49, 6  ;;  %v498_v55 = vrot.slane %v490_v45, 1  ;;  %v1655_v0 = vstv %s3155_s4  ;;  %v456_v46 = vadd.f32 %v3031_v32, %v3013_v16 }
  0xf3   : > { %v1639_v54 = vrot.slane %v1632_v22, 6  ;;  %v1636_v29 = vrot.slane %v1630_v51, 6  ;;  %v1657_v14 = vmul.f32 %v2887_v60, %v1655_v0  ;;  %v1656_v17 = vmul.f32 %v2897_v1, %v1655_v0 }
  0xf4   : > { %1585 = vrot.lane.b32.xlu1 %v1582_v2, %s2145_s17  ;;  %1583 = vrot.lane.b32.xlu0 %v1580_v15, %s2145_s17  ;;  %s3169_s17 = sld [smem:[#allocation4 + $0xe]]  ;;  %v1658_v15 = vmul.f32 %v2957_v61, %v1655_v0  ;;  %v499_v13 = vsel %vm494_vm4, %v496_v44, %v498_v55  ;;  %v477_v27 = vadd.f32 %v3043_v43, %v457_v42  ;;  %v684_v36 = vstv %s3171_s27 }
  0xf5   : > { %v1640_v56 = vsel %vm1494_vm9, %v1637_v52, %v1639_v54  ;;  %v1638_v57 = vsel %vm1494_vm9, %v1636_v29, %v1637_v52  ;;  %v476_v21 = vadd.f32 %v3049_v48, %v456_v46  ;;  %v497_v16 = vsel %vm494_vm4, %v495_v62, %v496_v44 }
  0xf6   : > { %v3146_v26 = vpop.permute.xlu1 %643  ;;  %v3151_v11 = vpop.permute.xlu0 %641  ;;  %v1650_v10 = vstv %s3143_s29  ;;  %v503_v12 = vadd.f32 %v499_v13, %v477_v27  ;;  %v686_v49 = vmul.f32 %v2887_v60, %v684_v36  ;;  %v687_v22 = vmul.f32 %v2957_v61, %v684_v36 }
  0xf7   : > { %v1652_v40 = vmul.f32 %v1650_v10, %v2436_v8  ;;  %v1653_v9 = vmul.f32 %v1650_v10, %v2494_v23  ;;  %v1651_v2 = vmul.f32 %v1650_v10, %v2434_v53  ;;  %v685_v52 = vmul.f32 %v2897_v1, %v684_v36 }
  0xf8   : > { %1614 = vrot.lane.b32.xlu1 %v1611_v39, %s2146_s21  ;;  %1612 = vrot.lane.b32.xlu0 %v1609_v6, %s2146_s21  ;;  %v502_v39 = vadd.f32 %v497_v16, %v476_v21  ;;  %v532_v51 = vadd.f32 %v3064_v30, %v503_v12  ;;  %s1854_s21 = sld [smem:[#allocation4 + $0x15]]  ;;  %vm1690_vm10 = vcmask 130048  }
  0xf9   : > { %v1660_v25 = vadd.f32 %v1657_v14, %v1652_v40  ;;  %v1661_v5 = vadd.f32 %v1658_v15, %v1653_v9  ;;  %v1659_v28 = vadd.f32 %v1656_v17, %v1651_v2 }
  0xfa   : > { %v3164_v24 = vpop.permute.xlu1 %672  ;;  %v3166_v50 = vpop.permute.xlu0 %670  ;;  %v679_v34 = vstv %s3169_s17  ;;  %v531_v54 = vadd.f32 %v3072_v38, %v502_v39  ;;  %v561_v44 = vadd.f32 %v3085_v47, %v532_v51 }
  0xfb   : > { %v1666_v31 = vrot.slane %v1660_v25, 6  ;;  %v1668_v7 = vrot.slane %v1661_v5, 6  ;;  %v1665_v33 = vrot.slane %v1659_v28, 6  ;;  %v681_v45 = vmul.f32 %v679_v34, %v2436_v8 }
  0xfc   : > { %1643 = vrot.lane.b32.xlu1 %v1640_v56, %s2147_s26  ;;  %1641 = vrot.lane.b32.xlu0 %v1638_v57, %s2147_s26  ;;  %v682_v6 = vmul.f32 %v679_v34, %v2494_v23  ;;  %v680_v3 = vmul.f32 %v679_v34, %v2434_v53  ;;  %v560_v56 = vadd.f32 %v3094_v4, %v531_v54  ;;  %s1855_s26 = sld [smem:[#allocation4 + $0x46]] }
  0xfd   : > { %v1669_v43 = vsel %vm1494_vm9, %v1666_v31, %v1668_v7  ;;  %v1667_v48 = vsel %vm1494_vm9, %v1665_v33, %v1666_v31  ;;  %v689_v10 = vadd.f32 %v686_v49, %v681_v45  ;;  %v590_v40 = vadd.f32 %v3108_v35, %v561_v44 }
  0xfe   : > { %v3176_v59 = vpop.permute.xlu1 %727  ;;  %v3183_v63 = vpop.permute.xlu0 %725  ;;  %v690_v57 = vadd.f32 %v687_v22, %v682_v6  ;;  %v688_v9 = vadd.f32 %v685_v52, %v680_v3  ;;  %v589_v42 = vadd.f32 %v3115_v20, %v560_v56 }
  0xff   : > { %v619_v62 = vadd.f32 %v3127_v37, %v590_v40  ;;  %v696_v2 = vrot.slane %v689_v10, 2 }
 0x100   : > { %1672 = vrot.lane.b32.xlu1 %v1669_v43, %s2148_s6  ;;  %1670 = vrot.lane.b32.xlu0 %v1667_v48, %s2148_s6  ;;  %v618_v38 = vadd.f32 %v3132_v41, %v589_v42  ;;  %v698_v47 = vrot.slane %v690_v57, 2  ;;  %v695_v4 = vrot.slane %v688_v9, 2  ;;  %v879_v41 = vstv %s1854_s21  ;;  %s1868_s6 = sld [smem:[#allocation4 + $0x1c]] }
 0x101   : > { %v648_v46 = vadd.f32 %v3146_v26, %v619_v62  ;;  %v881_v26 = vmul.f32 %v879_v41, %v2436_v8  ;;  %v880_v7 = vmul.f32 %v879_v41, %v2434_v53  ;;  %v1084_v62 = vstv %s1869_s3 }
 0x102   : > { %v3195_v58 = vpop.permute.xlu1 %756  ;;  %v3198_v32 = vpop.permute.xlu0 %754  ;;  %v647_v14 = vadd.f32 %v3151_v11, %v618_v38  ;;  %v699_v37 = vsel %vm694_vm5, %v696_v2, %v698_v47  ;;  %v697_v13 = vsel %vm694_vm5, %v695_v4, %v696_v2  ;;  %v884_v25 = vstv %s1855_s26 }
 0x103   : > { %v677_v35 = vadd.f32 %v3164_v24, %v648_v46  ;;  %v882_v11 = vmul.f32 %v879_v41, %v2494_v23  ;;  %v886_v16 = vmul.f32 %v2887_v60, %v884_v25  ;;  %v887_v24 = vmul.f32 %v2957_v61, %v884_v25 }
 0x104   : > { %v676_v20 = vadd.f32 %v3166_v50, %v647_v14  ;;  %v885_v33 = vmul.f32 %v2897_v1, %v884_v25  ;;  %v1087_v46 = vmul.f32 %v2957_v61, %v1084_v62 }
 0x105   : > { %v703_v21 = vadd.f32 %v699_v37, %v677_v35  ;;  %v889_v43 = vadd.f32 %v886_v16, %v881_v26  ;;  %v890_v48 = vadd.f32 %v887_v24, %v882_v11 }
 0x106   : > { %v786_v18 = vpop.permute.xlu1 %785  ;;  %v784_v19 = vpop.permute.xlu0 %783  ;;  %v702_v28 = vadd.f32 %v697_v13, %v676_v20  ;;  %v888_v49 = vadd.f32 %v885_v33, %v880_v7 }
 0x107   : > { %v732_v50 = vadd.f32 %v3176_v59, %v703_v21  ;;  %v896_v52 = vrot.slane %v889_v43, 3  ;;  %v898_v54 = vrot.slane %v890_v48, 3 }
 0x108   : > { %v731_v34 = vadd.f32 %v3183_v63, %v702_v28  ;;  %v895_v63 = vrot.slane %v888_v49, 3 }
 0x109   : > { %v761_v36 = vadd.f32 %v3195_v58, %v732_v50  ;;  %v899_v40 = vsel %vm894_vm6, %v896_v52, %v898_v54 }
 0x10a   : > { %v815_v29 = vpop.permute.xlu1 %814  ;;  %v813_v55 = vpop.permute.xlu0 %812  ;;  %v760_v39 = vadd.f32 %v3198_v32, %v731_v34 }
 0x10b   : > { %v790_v6 = vadd.f32 %v786_v18, %v761_v36  ;;  %v897_v18 = vsel %vm894_vm6, %v895_v63, %v896_v52 }
 0x10c   : > { %v789_v51 = vadd.f32 %v784_v19, %v760_v39 }
 0x10d   : > { %v819_v3 = vadd.f32 %v815_v29, %v790_v6  ;;  %v1079_v29 = vstv %s1868_s6 }
 0x10e   : > { %v844_v30 = vpop.permute.xlu1 %843  ;;  %v842_v0 = vpop.permute.xlu0 %841  ;;  %v818_v59 = vadd.f32 %v813_v55, %v789_v51  ;;  %v1081_v47 = vmul.f32 %v1079_v29, %v2436_v8  ;;  %v1080_v14 = vmul.f32 %v1079_v29, %v2434_v53  ;;  %v1284_v51 = vstv %s1883_s8 }
 0x10f   : > { %v848_v56 = vadd.f32 %v844_v30, %v819_v3  ;;  %v1082_v30 = vmul.f32 %v1079_v29, %v2494_v23 }
 0x110   : > { %v847_v58 = vadd.f32 %v842_v0, %v818_v59  ;;  %v1086_v0 = vmul.f32 %v2887_v60, %v1084_v62 }
 0x111   : > { %v1090_v41 = vadd.f32 %v1087_v46, %v1082_v30 }
 0x112   : > { %v873_v15 = vpop.permute.xlu1 %872  ;;  %v871_v17 = vpop.permute.xlu0 %870  ;;  %v1089_v21 = vadd.f32 %v1086_v0, %v1081_v47 }
 0x113   : > { %v877_v57 = vadd.f32 %v873_v15, %v848_v56  ;;  %v876_v32 = vadd.f32 %v871_v17, %v847_v58  ;;  %v1085_v15 = vmul.f32 %v2897_v1, %v1084_v62  ;;  %v1098_v7 = vrot.slane %v1090_v41, 4 }
 0x114   : > { %v1096_v50 = vrot.slane %v1089_v21, 4  ;;  %v1287_v56 = vmul.f32 %v2957_v61, %v1284_v51  ;;  %v1484_v41 = vstv %s1897_s18 }
 0x115   : > { %v903_v19 = vadd.f32 %v899_v40, %v877_v57  ;;  %v902_v38 = vadd.f32 %v897_v18, %v876_v32  ;;  %v1088_v28 = vadd.f32 %v1085_v15, %v1080_v14  ;;  %v1285_v57 = vmul.f32 %v2897_v1, %v1284_v51 }
 0x116   : > { %v928_v27 = vpop.permute.xlu1 %927  ;;  %v926_v5 = vpop.permute.xlu0 %925  ;;  %v1099_v43 = vsel %vm1094_vm7, %v1096_v50, %v1098_v7 }
 0x117   : > { %v932_v4 = vadd.f32 %v928_v27, %v903_v19  ;;  %v931_v35 = vadd.f32 %v926_v5, %v902_v38  ;;  %v1095_v34 = vrot.slane %v1088_v28, 4 }
 0x119   : > { %v1097_v48 = vsel %vm1094_vm7, %v1095_v34, %v1096_v50  ;;  %v1487_v50 = vmul.f32 %v2957_v61, %v1484_v41  ;;  %v2024_v34 = vld [vmem:[#allocation3] sm:$0xff] }
 0x11a   : > { %v957_v31 = vpop.permute.xlu1 %956  ;;  %v955_v12 = vpop.permute.xlu0 %954 }
 0x11b   : > { %v961_v20 = vadd.f32 %v957_v31, %v932_v4  ;;  %v960_v13 = vadd.f32 %v955_v12, %v931_v35 }
 0x11e   : > { %v986_v45 = vpop.permute.xlu1 %985  ;;  %v984_v22 = vpop.permute.xlu0 %983 }
 0x11f   : > { %v990_v25 = vadd.f32 %v986_v45, %v961_v20  ;;  %v989_v26 = vadd.f32 %v984_v22, %v960_v13  ;;  %v1279_v22 = vstv %s1882_s7 }
 0x120   : > { %v1281_v52 = vmul.f32 %v1279_v22, %v2436_v8  ;;  %v1282_v54 = vmul.f32 %v1279_v22, %v2494_v23  ;;  %v1280_v58 = vmul.f32 %v1279_v22, %v2434_v53 }
 0x122   : > { %v1015_v44 = vpop.permute.xlu1 %1014  ;;  %v1013_v10 = vpop.permute.xlu0 %1012  ;;  %v1290_v19 = vadd.f32 %v1287_v56, %v1282_v54  ;;  %v1288_v38 = vadd.f32 %v1285_v57, %v1280_v58 }
 0x123   : > { %v1019_v16 = vadd.f32 %v1015_v44, %v990_v25  ;;  %v1018_v27 = vadd.f32 %v1013_v10, %v989_v26  ;;  %v1286_v44 = vmul.f32 %v2887_v60, %v1284_v51 }
 0x124   : > { %v1298_v30 = vrot.slane %v1290_v19, 5  ;;  %v1295_v4 = vrot.slane %v1288_v38, 5 }
 0x126   : > { %v1044_v9 = vpop.permute.xlu1 %1043  ;;  %v1042_v42 = vpop.permute.xlu0 %1041 }
 0x127   : > { %v1048_v33 = vadd.f32 %v1044_v9, %v1019_v16  ;;  %v1047_v5 = vadd.f32 %v1042_v42, %v1018_v27  ;;  %v1289_v42 = vadd.f32 %v1286_v44, %v1281_v52 }
 0x129   : > { %v1296_v47 = vrot.slane %v1289_v42, 5 }
 0x12a   : > { %v1073_v55 = vpop.permute.xlu1 %1072  ;;  %v1071_v2 = vpop.permute.xlu0 %1070 }
 0x12b   : > { %v1077_v31 = vadd.f32 %v1073_v55, %v1048_v33  ;;  %v1076_v12 = vadd.f32 %v1071_v2, %v1047_v5  ;;  %v1297_v13 = vsel %vm1294_vm8, %v1295_v4, %v1296_v47  ;;  %v1485_v5 = vmul.f32 %v2024_v34, %v1484_v41 }
 0x12d   : > { %v1103_v6 = vadd.f32 %v1099_v43, %v1077_v31  ;;  %v1102_v3 = vadd.f32 %v1097_v48, %v1076_v12 }
 0x12e   : > { %v1128_v17 = vpop.permute.xlu1 %1127  ;;  %v1126_v37 = vpop.permute.xlu0 %1125 }
 0x12f   : > { %v1132_v63 = vadd.f32 %v1128_v17, %v1103_v6  ;;  %v1131_v32 = vadd.f32 %v1126_v37, %v1102_v3  ;;  %v1299_v17 = vsel %vm1294_vm8, %v1296_v47, %v1298_v30  ;;  %v1479_v37 = vstv %s1896_s12 }
 0x130   : > { %v1481_v28 = vmul.f32 %v1479_v37, %v2436_v8  ;;  %v1482_v16 = vmul.f32 %v1479_v37, %v2494_v23  ;;  %v1480_v33 = vmul.f32 %v1479_v37, %v2434_v53 }
 0x132   : > { %v1157_v11 = vpop.permute.xlu1 %1156  ;;  %v1155_v24 = vpop.permute.xlu0 %1154  ;;  %v1490_v43 = vadd.f32 %v1487_v50, %v1482_v16 }
 0x133   : > { %v1161_v40 = vadd.f32 %v1157_v11, %v1132_v63  ;;  %v1160_v9 = vadd.f32 %v1155_v24, %v1131_v32  ;;  %v2023_v24 = vld [vmem:[#allocation3 + $0x8] sm:$0xff] }
 0x134   : > { %v1486_v27 = vmul.f32 %v2023_v24, %v1484_v41  ;;  %v1498_v3 = vrot.slane %v1490_v43, 6 }
 0x136   : > { %v1186_v36 = vpop.permute.xlu1 %1185  ;;  %v1184_v39 = vpop.permute.xlu0 %1183  ;;  %v1489_v12 = vadd.f32 %v1486_v27, %v1481_v28 }
 0x137   : > { %v1190_v29 = vadd.f32 %v1186_v36, %v1161_v40  ;;  %v1189_v60 = vadd.f32 %v1184_v39, %v1160_v9 }
 0x138   : > { %v1496_v51 = vrot.slane %v1489_v12, 6 }
 0x13a   : > { %v1215_v45 = vpop.permute.xlu1 %1214  ;;  %v1213_v49 = vpop.permute.xlu0 %1212  ;;  %v1499_v63 = vsel %vm1494_vm9, %v1496_v51, %v1498_v3 }
 0x13b   : > { %v1219_v55 = vadd.f32 %v1215_v45, %v1190_v29  ;;  %v1218_v2 = vadd.f32 %v1213_v49, %v1189_v60  ;;  %v1488_v45 = vadd.f32 %v1485_v5, %v1480_v33 }
 0x13d   : > { %v1495_v52 = vrot.slane %v1488_v45, 6 }
 0x13e   : > { %v1244_v59 = vpop.permute.xlu1 %1243  ;;  %v1242_v10 = vpop.permute.xlu0 %1241 }
 0x13f   : > { %v1248_v46 = vadd.f32 %v1244_v59, %v1219_v55  ;;  %v1247_v14 = vadd.f32 %v1242_v10, %v1218_v2  ;;  %v1497_v57 = vsel %vm1494_vm9, %v1495_v52, %v1496_v51 }
 0x142   : > { %v1273_v18 = vpop.permute.xlu1 %1272  ;;  %v1271_v62 = vpop.permute.xlu0 %1270 }
 0x143   : > { %v1277_v15 = vadd.f32 %v1273_v18, %v1248_v46  ;;  %v1276_v35 = vadd.f32 %v1271_v62, %v1247_v14 }
 0x145   : > { %v1303_v25 = vadd.f32 %v1299_v17, %v1277_v15  ;;  %v1302_v26 = vadd.f32 %v1297_v13, %v1276_v35 }
 0x146   : > { %v1328_v0 = vpop.permute.xlu1 %1327  ;;  %v1326_v1 = vpop.permute.xlu0 %1325 }
 0x147   : > { %v1332_v36 = vadd.f32 %v1328_v0, %v1303_v25  ;;  %v1331_v31 = vadd.f32 %v1326_v1, %v1302_v26 }
 0x14a   : > { %v1357_v20 = vpop.permute.xlu1 %1356  ;;  %v1355_v21 = vpop.permute.xlu0 %1354 }
 0x14b   : > { %v1361_v48 = vadd.f32 %v1357_v20, %v1332_v36  ;;  %v1360_v6 = vadd.f32 %v1355_v21, %v1331_v31 }
 0x14e   : > { %v1386_v11 = vpop.permute.xlu1 %1385  ;;  %v1384_v7 = vpop.permute.xlu0 %1383 }
 0x14f   : > { %v1390_v49 = vadd.f32 %v1386_v11, %v1361_v48  ;;  %v1389_v23 = vadd.f32 %v1384_v7, %v1360_v6 }
 0x152   : > { %v1415_v39 = vpop.permute.xlu1 %1414  ;;  %v1413_v8 = vpop.permute.xlu0 %1412 }
 0x153   : > { %v1419_v61 = vadd.f32 %v1415_v39, %v1390_v49  ;;  %v1418_v53 = vadd.f32 %v1413_v8, %v1389_v23 }
 0x156   : > { %v1444_v22 = vpop.permute.xlu1 %1443  ;;  %v1442_v59 = vpop.permute.xlu0 %1441 }
 0x157   : > { %v1448_v54 = vadd.f32 %v1444_v22, %v1419_v61  ;;  %v1447_v44 = vadd.f32 %v1442_v59, %v1418_v53 }
 0x15a   : > { %v1473_v56 = vpop.permute.xlu1 %1472  ;;  %v1471_v58 = vpop.permute.xlu0 %1470 }
 0x15b   : > { %v1477_v10 = vadd.f32 %v1473_v56, %v1448_v54  ;;  %v1476_v32 = vadd.f32 %v1471_v58, %v1447_v44 }
 0x15d   : > { %v1503_v40 = vadd.f32 %v1499_v63, %v1477_v10  ;;  %v1502_v18 = vadd.f32 %v1497_v57, %v1476_v32 }
 0x15e   : > { %v1528_v9 = vpop.permute.xlu1 %1527  ;;  %v1526_v42 = vpop.permute.xlu0 %1525 }
 0x15f   : > { %v1532_v2 = vadd.f32 %v1528_v9, %v1503_v40  ;;  %v1531_v47 = vadd.f32 %v1526_v42, %v1502_v18 }
 0x162   : > { %v1557_v19 = vpop.permute.xlu1 %1556  ;;  %v1555_v29 = vpop.permute.xlu0 %1554 }
 0x163   : > { %v1561_v30 = vadd.f32 %v1557_v19, %v1532_v2  ;;  %v1560_v0 = vadd.f32 %v1555_v29, %v1531_v47 }
 0x166   : > { %v1586_v62 = vpop.permute.xlu1 %1585  ;;  %v1584_v38 = vpop.permute.xlu0 %1583 }
 0x167   : > { %v1590_v1 = vadd.f32 %v1586_v62, %v1561_v30  ;;  %v1589_v14 = vadd.f32 %v1584_v38, %v1560_v0 }
 0x16a   : > { %v1615_v60 = vpop.permute.xlu1 %1614  ;;  %v1613_v55 = vpop.permute.xlu0 %1612 }
 0x16b   : > { %v1619_v15 = vadd.f32 %v1615_v60, %v1590_v1  ;;  %v1618_v35 = vadd.f32 %v1613_v55, %v1589_v14 }
 0x16e   : > { %v1644_v46 = vpop.permute.xlu1 %1643  ;;  %v1642_v4 = vpop.permute.xlu0 %1641 }
 0x16f   : > { %v1648_v17 = vadd.f32 %v1644_v46, %v1619_v15  ;;  %v1647_v20 = vadd.f32 %v1642_v4, %v1618_v35 }
 0x172   : > { %v1673_v37 = vpop.permute.xlu1 %1672  ;;  %v1671_v13 = vpop.permute.xlu0 %1670 }
 0x173   : > { %v1677_v21 = vadd.f32 %v1673_v37, %v1648_v17  ;;  %v1676_v41 = vadd.f32 %v1671_v13, %v1647_v20 }
 0x175   : > { %v1911_v25 = vmul.f32 -1.442695, %v1677_v21  ;;  %v1910_v28 = vmul.f32 -1.442695, %v1676_v41 }
 0x177   : > { %2012 = vpow2.f32 %v1911_v25 }
 0x178   : > { %2014 = vpow2.f32 %v1910_v28 }
 0x181   : > { %v2013_v26 = vpop.eup %2012 }
 0x182   : > { %v2015_v11 = vpop.eup %2014  ;;  %v1685_v16 = vadd.f32 1.0, %v2013_v26 }
 0x183   : > { %v1684_v24 = vadd.f32 1.0, %v2015_v11 }
 0x184   : > { %2016 = vrcp.f32 %v1685_v16 }
 0x185   : > { %2018 = vrcp.f32 %v1684_v24 }
 0x18e   : > { %v2017_v27 = vpop.eup %2016 }
 0x18f   : > { %v2019_v50 = vpop.eup %2018  ;;  %1692 = vst.msk [vmem:[%s2268_s28 + $0x8] sm:$0xff] %vm1690_vm10, %v2017_v27 }
 0x190   : > { %1691 = vst.msk [vmem:[%s2268_s28] sm:$0xff] %vm1690_vm10, %v2019_v50 }
 0x191 PF: > { %s1917_s24 = sshll.u32 %s2126_s13, 8  ;;  %s1707_s17 = sshll.u32 %s2268_s28, 4  ;;  %s3269_s17 = int_to_ptr.vmem [resolvable:$true] %s1707_s17 }
 0x192   : > { %s3266_s4 = scalar_lea.hbm %s3327_s2, %s1917_s24  ;;  %s3273_s27 = scalar_lea.sflag [#allocation5], %s173_s5 }
 0x193   : > { %s2040_s21 = scalar_lea.vmem %s3269_s17, 256  ;;  %s2149_s13 = smov [#allocation7]  }
 0x194   : > { %p2041_p13 = scmp.ne.s32.totalorder %s3269_s17, %s2040_s21  ;;  %s2044_s26 = sshll.u32 %s2149_s13, 4  ;;  %s2045_s26 = int_to_ptr.vmem [resolvable:$false] %s2044_s26 }
 0x195   : > { %s2046_s6 = scalar_lea.vmem %s2045_s26, 512  ;;  %p2047_p2 = scmp.lt.s32.totalorder %s3269_s17, %s2045_s26 }
 0x196   : > { %p2042_p0 = pnand %p2041_p13, %p2217_p3  ;;  %p2048_p4 = scmp.lt.s32.totalorder %s2046_s6, %s2040_s21 }
 0x198   : > { %p2043_p1 = pneg %p2042_p0  ;;  %p2049_p5 = por %p2048_p4, %p2047_p2 }
 0x19a   : > { %p2050_p6 = pnand %p2049_p5, %p2043_p1 }
 0x19c   : > { %2053 = shalt.err (!%p2050_p6)
}
 0x19d   : > { %s2054_s5 = scalar_lea.hbm %s3266_s4, 256  ;;  %s2058_s7 = scalar_lea.hbm %s3327_s2, 512 }
 0x19e   : > { %p2055_p7 = scmp.ne.s32.totalorder %s3266_s4, %s2054_s5  ;;  %p2059_p11 = scmp.lt.u32.totalorder %s3266_s4, %s3327_s2 }
 0x19f   : > { %p2060_p10 = scmp.lt.u32.totalorder %s2058_s7, %s2054_s5  ;;  %p2062_p13 = scmp.lt.u32.totalorder %s2054_s5, %s3266_s4 }
 0x1a0   : > { %p2056_p8 = pnand %p2055_p7, %p2217_p3 }
 0x1a1   : > { %p2061_p12 = por %p2060_p10, %p2059_p11 }
 0x1a2   : > { %p2057_p9 = pneg %p2056_p8 }
 0x1a3   : > { %p2063_p0 = por %p2062_p13, %p2061_p12 }
 0x1a5   : > { %p2064_p1 = pnand %p2063_p0, %p2057_p9 }
 0x1a7   : > { %2067 = shalt.err (!%p2064_p1)
}
 0x1a8   : > { %s2150_s18 = smov 128   ;;  %s2151_s24 = smov 8  }
 0x1a9   : > { %1924 = dma.vmem_to_hbm [thread:$0]  (%p2217_p3), %s3269_s17, 256, %s3266_s4, %s3273_s27, %s2150_s18, %s2150_s18, %s2151_s24  }
 0x1aa PF: > { %p1936_p2 = scmp.ge.s32.totalorder %s2138_s16, 2  ;;  %s1722_s25 = sand.u32 1, %s2110_s9  }
 0x1ab   : > { %p3332_p4 = scmp.ne.s32.totalorder %s3329_s23, 0  ;;  %s1723_s29 = scalar_lea.sflag [#allocation5], %s1722_s25 }
 0x1ad   : > { %p1931_p5 = pnand %p1936_p2, %p3332_p4 }
 0x1af   : > { %2105 = dma.done.wait (!%p1931_p5), %s1723_s29, 256  }
 0x1b0   : > { %2107 = vsyncadd (!%p1931_p5), %s1723_s29, 4294967040  ;;  %s16_s16 = sadd.s32 1, %s2138_s16   ;;  %s3333_s9 = smov %s2114_s10 }
 0x1b1   : > { %p13_p6 = scmp.ge.s32.totalorder %s16_s16, 6   ;;  %s3334_s10 = smov %s2118_s11 }
 0x1b2   : > { %s3335_s11 = smov %s2247_s30  ;;  %s3336_s12 = smov %s2130_s14 }
 0x1b3   : > { %s3337_s13 = smov %s2134_s15  ;;  %s3338_s14 = smov %s3341_s19 }
 0x1b4   : > { %s3339_s15 = smov %s3345_s20  ;;  %15 = sbr.rel (!%p13_p6) target bundleno = 6 (0x6), region = 76 }
 0x1bb   :  { %1728 = vsyncpa [#allocation5], 1 }
 0x1bc   :  { %1730 = vsyncpa [#allocation5 + $0x1], 1 }
 0x1bd   :  { %1731 = vsyncpa [#allocation6], 1 }
 0x1be   :  { %1733 = vsyncpa [#allocation6 + $0x1], 1 }

</bundles_post_ra>
